<compile_context>
chip_gen: v7x
topology: tpu7x:2x2x1
jax: 0.10.0
libtpu: 0.0.40
codegen_flags: <defaults>
</compile_context>

<pallas_src>
import jax
import jax.numpy as jnp
import numpy as np
from jax.experimental import pallas as pl
from jax.experimental.pallas import tpu as pltpu


# ----------------------------------------------------------------------------
# Fused LeNet-5 kernel: one grid step == one sample, everything in VMEM.
# ----------------------------------------------------------------------------
def _lenet_kernel(x_ref,
                  r1_ref, m1_ref, b1_ref, pr1_ref, pc1_ref,
                  r2_ref, m2_ref, b2_ref, pr2_ref, pc2_ref,
                  r3_ref, m3_ref, b3_ref,
                  fc1w_ref, fc1b_ref, fc2w_ref, fc2b_ref,
                  o_ref):
    f32 = jnp.float32

    def conv_relu(x, r_ref, m_ref, b_ref):
        # x: (H, C*W);  out: (OH, OC*OW) = sum_kh R_kh @ (x @ M_kh) + b, ReLU
        k = r_ref.shape[0]
        acc = None
        for kh in range(k):                                   # static unroll (k=5)
            y = jnp.dot(x, m_ref[kh], preferred_element_type=f32)   # (H, OC*OW)
            y = jnp.dot(r_ref[kh], y, preferred_element_type=f32)   # (OH, OC*OW)
            acc = y if acc is None else acc + y
        return jnp.maximum(acc + b_ref[...], 0.0)

    def avgpool2(x, pr_ref, pc_ref):
        # 2x2 average pool as two constant matmuls: Prow @ x @ Pcol
        y = jnp.dot(pr_ref[...], x, preferred_element_type=f32)
        return jnp.dot(y, pc_ref[...], preferred_element_type=f32)

    x = x_ref[...]                                   # (32, 32)   == (H, C*W), C=1
    y = conv_relu(x, r1_ref, m1_ref, b1_ref)         # (28, 6*28)
    y = avgpool2(y, pr1_ref, pc1_ref)                # (14, 6*14)
    y = conv_relu(y, r2_ref, m2_ref, b2_ref)         # (10, 16*10)
    y = avgpool2(y, pr2_ref, pc2_ref)                # (5, 16*5)
    y = conv_relu(y, r3_ref, m3_ref, b3_ref)         # (1, 120)  == flattened view
    y = jnp.maximum(
        jnp.dot(y, fc1w_ref[...], preferred_element_type=jnp.float32)
        + fc1b_ref[...], 0.0)                        # (1, 84)
    y = (jnp.dot(y, fc2w_ref[...], preferred_element_type=jnp.float32)
         + fc2b_ref[...])                            # (1, 10)
    o_ref[...] = y


# ----------------------------------------------------------------------------
# One-time parameter preprocessing (hoisted out of the forward pass)
# ----------------------------------------------------------------------------
def _conv_mats(w, b, *, H, W):
    """Build the (R_kh, M_kh, tiled-bias) constants for a valid 5x5 conv.

    Activation layout is (H, C*W); output layout is (OH, OC*OW).
      M_kh[c*W + wi, oc*OW + ow] = w[oc, c, kh, wi-ow]   if 0 <= wi-ow < k
      R_kh[oh, h]                = 1                      if h == oh + kh
    """
    w = jnp.asarray(w, jnp.float32)
    OC, C, k, _ = w.shape
    OH, OW = H - k + 1, W - k + 1

    wi = np.arange(W)[:, None]                     # (W, 1)
    ow = np.arange(OW)[None, :]                    # (1, OW)
    kw = wi - ow                                   # (W, OW)
    valid = (kw >= 0) & (kw < k)
    kw_c = np.clip(kw, 0, k - 1)

    wg = w[:, :, :, kw_c]                          # (OC, C, k, W, OW)
    wg = jnp.where(jnp.asarray(valid)[None, None, None], wg, 0.0)
    M = wg.transpose(2, 1, 3, 0, 4).reshape(k, C * W, OC * OW)   # (k, C*W, OC*OW)

    oh = np.arange(OH)[:, None]
    h = np.arange(H)[None, :]
    R = np.stack([(h == oh + kh) for kh in range(k)]).astype(np.float32)  # (k,OH,H)

    bt = jnp.repeat(jnp.asarray(b, jnp.float32), OW).reshape(1, OC * OW)
    return jnp.asarray(R), M, bt


def _pool_mats(*, C, H, W):
    """AvgPool2d(2) as Prow (Ho,H) and Pcol (C*W, C*Wo) constant matrices."""
    Ho, Wo = H // 2, W // 2
    pr = np.zeros((Ho, H), np.float32)
    pr[np.arange(H) // 2, np.arange(H)] = 0.5
    pc = np.zeros((C * W, C * Wo), np.float32)
    cc = np.repeat(np.arange(C), W)
    ww = np.tile(np.arange(W), C)
    pc[np.arange(C * W), cc * Wo + ww // 2] = 0.5
    return jnp.asarray(pr), jnp.asarray(pc)


def prepare_params(p):
    """Convert PyTorch-layout params into the kernel's constant matrices (once)."""
    c = {}
    c["r1"], c["m1"], c["b1"] = _conv_mats(p["conv1_w"], p["conv1_b"], H=32, W=32)
    c["pr1"], c["pc1"] = _pool_mats(C=6, H=28, W=28)
    c["r2"], c["m2"], c["b2"] = _conv_mats(p["conv2_w"], p["conv2_b"], H=14, W=14)
    c["pr2"], c["pc2"] = _pool_mats(C=16, H=10, W=10)
    c["r3"], c["m3"], c["b3"] = _conv_mats(p["conv3_w"], p["conv3_b"], H=5, W=5)
    c["fc1_wT"] = jnp.asarray(p["fc1_w"], jnp.float32).T
    c["fc1_b"] = jnp.asarray(p["fc1_b"], jnp.float32).reshape(1, -1)
    c["fc2_wT"] = jnp.asarray(p["fc2_w"], jnp.float32).T
    c["fc2_b"] = jnp.asarray(p["fc2_b"], jnp.float32).reshape(1, -1)
    return c


# ----------------------------------------------------------------------------
# Forward: a single pallas_call over grid=(batch,)
# ----------------------------------------------------------------------------
def lenet5_forward(x, consts):
    B = x.shape[0]
    x2d = x.reshape(B, 32, 32).astype(jnp.float32)   # drop the C=1 channel dim

    args = [
        x2d,
        consts["r1"], consts["m1"], consts["b1"], consts["pr1"], consts["pc1"],
        consts["r2"], consts["m2"], consts["b2"], consts["pr2"], consts["pc2"],
        consts["r3"], consts["m3"], consts["b3"],
        consts["fc1_wT"], consts["fc1_b"], consts["fc2_wT"], consts["fc2_b"],
    ]

    def const_spec(a):
        nd = a.ndim
        return pl.BlockSpec(a.shape, lambda b, _nd=nd: (0,) * _nd)

    in_specs = [pl.BlockSpec((None, 32, 32), lambda b: (b, 0, 0))]
    in_specs += [const_spec(a) for a in args[1:]]

    out = pl.pallas_call(
        _lenet_kernel,
        out_shape=jax.ShapeDtypeStruct((B, 1, 10), jnp.float32),
        grid=(B,),
        in_specs=in_specs,
        out_specs=pl.BlockSpec((None, 1, 10), lambda b: (b, 0, 0)),
        compiler_params=pltpu.CompilerParams(
            dimension_semantics=("parallel",)),
    )(*args)
    return out.reshape(B, 10)


# ----------------------------------------------------------------------------
# Pure-JAX reference (for correctness check)
# ----------------------------------------------------------------------------
def ref_forward(x, p):
    def conv_relu(x, w, b):
        y = jax.lax.conv_general_dilated(
            x, w, window_strides=(1, 1), padding="VALID",
            dimension_numbers=("NCHW", "OIHW", "NCHW"))
        return jax.nn.relu(y + b[None, :, None, None])

    def pool(x):
        B, C, H, W = x.shape
        return x.reshape(B, C, H // 2, 2, W // 2, 2).mean(axis=(3, 5))

    y = pool(conv_relu(x, p["conv1_w"], p["conv1_b"]))
    y = pool(conv_relu(y, p["conv2_w"], p["conv2_b"]))
    y = conv_relu(y, p["conv3_w"], p["conv3_b"]).reshape(x.shape[0], 120)
    y = jax.nn.relu(y @ p["fc1_w"].T + p["fc1_b"])
    y = y @ p["fc2_w"].T + p["fc2_b"]
    return y


# ----------------------------------------------------------------------------
# Deterministic parameter init (PyTorch-style uniform(-1/sqrt(fan_in), +))
# ----------------------------------------------------------------------------
def init_params(key):
    def uinit(key, shape, fan_in):
        bound = 1.0 / np.sqrt(fan_in)
        return jax.random.uniform(key, shape, jnp.float32, -bound, bound)

    ks = jax.random.split(key, 10)
    return {
        "conv1_w": uinit(ks[0], (6, 1, 5, 5), 1 * 5 * 5),
        "conv1_b": uinit(ks[1], (6,), 1 * 5 * 5),
        "conv2_w": uinit(ks[2], (16, 6, 5, 5), 6 * 5 * 5),
        "conv2_b": uinit(ks[3], (16,), 6 * 5 * 5),
        "conv3_w": uinit(ks[4], (120, 16, 5, 5), 16 * 5 * 5),
        "conv3_b": uinit(ks[5], (120,), 16 * 5 * 5),
        "fc1_w": uinit(ks[6], (84, 120), 120),
        "fc1_b": uinit(ks[7], (84,), 120),
        "fc2_w": uinit(ks[8], (10, 84), 84),
        "fc2_b": uinit(ks[9], (10,), 84),
    }


if __name__ == "__main__":
    key = jax.random.PRNGKey(0)
    pkey, xkey = jax.random.split(key)
    params = init_params(pkey)
    consts = prepare_params(params)   # one-time weight preprocessing

    # Classic LeNet-5 input: batch=2, 1 channel, 32x32 (so conv3 output is 1x1
    # and view(-1, 120) is consistent).
    x = jax.random.normal(xkey, (2, 1, 32, 32), jnp.float32)

    fwd = jax.jit(lenet5_forward)
    out = jax.block_until_ready(fwd(x, consts))
    ref = jax.block_until_ready(ref_forward(x, params))

    assert out.shape == (2, 10), out.shape
    np.testing.assert_allclose(np.asarray(out), np.asarray(ref),
                               rtol=1e-3, atol=1e-3)
    print("KERNEL_OK")
</pallas_src>

<mosaic_0001>
module attributes {stable_mosaic.version = 11 : i64} {
  func.func @_lenet_kernel(%arg0: i32, %arg1: memref<1x32x32xf32, #tpu.memory_space<vmem>>, %arg2: memref<5x28x32xf32, #tpu.memory_space<vmem>>, %arg3: memref<5x32x168xf32, #tpu.memory_space<vmem>>, %arg4: memref<1x168xf32, #tpu.memory_space<vmem>>, %arg5: memref<14x28xf32, #tpu.memory_space<vmem>>, %arg6: memref<168x84xf32, #tpu.memory_space<vmem>>, %arg7: memref<5x10x14xf32, #tpu.memory_space<vmem>>, %arg8: memref<5x84x160xf32, #tpu.memory_space<vmem>>, %arg9: memref<1x160xf32, #tpu.memory_space<vmem>>, %arg10: memref<5x10xf32, #tpu.memory_space<vmem>>, %arg11: memref<160x80xf32, #tpu.memory_space<vmem>>, %arg12: memref<5x1x5xf32, #tpu.memory_space<vmem>>, %arg13: memref<5x80x120xf32, #tpu.memory_space<vmem>>, %arg14: memref<1x120xf32, #tpu.memory_space<vmem>>, %arg15: memref<120x84xf32, #tpu.memory_space<vmem>>, %arg16: memref<1x84xf32, #tpu.memory_space<vmem>>, %arg17: memref<84x10xf32, #tpu.memory_space<vmem>>, %arg18: memref<1x10xf32, #tpu.memory_space<vmem>>, %arg19: memref<1x1x10xf32, #tpu.memory_space<vmem>>) attributes {dimension_semantics = [#tpu.dimension_semantics<parallel>], iteration_bounds = array<i64: 2>, scalar_prefetch = 0 : i64, scratch_operands = 0 : i64, tpu.core_type = #tpu.core_type<tc>, window_params = [{transform_indices = @transform_0, window_bounds = array<i64: 1, 32, 32>}, {pipeline_mode = #tpu.pipeline_mode<synchronous>, transform_indices = @transform_1, window_bounds = array<i64: 5, 28, 32>}, {pipeline_mode = #tpu.pipeline_mode<synchronous>, transform_indices = @transform_2, window_bounds = array<i64: 5, 32, 168>}, {pipeline_mode = #tpu.pipeline_mode<synchronous>, transform_indices = @transform_3, window_bounds = array<i64: 1, 168>}, {pipeline_mode = #tpu.pipeline_mode<synchronous>, transform_indices = @transform_4, window_bounds = array<i64: 14, 28>}, {pipeline_mode = #tpu.pipeline_mode<synchronous>, transform_indices = @transform_5, window_bounds = array<i64: 168, 84>}, {pipeline_mode = #tpu.pipeline_mode<synchronous>, transform_indices = @transform_6, window_bounds = array<i64: 5, 10, 14>}, {pipeline_mode = #tpu.pipeline_mode<synchronous>, transform_indices = @transform_7, window_bounds = array<i64: 5, 84, 160>}, {pipeline_mode = #tpu.pipeline_mode<synchronous>, transform_indices = @transform_8, window_bounds = array<i64: 1, 160>}, {pipeline_mode = #tpu.pipeline_mode<synchronous>, transform_indices = @transform_9, window_bounds = array<i64: 5, 10>}, {pipeline_mode = #tpu.pipeline_mode<synchronous>, transform_indices = @transform_10, window_bounds = array<i64: 160, 80>}, {pipeline_mode = #tpu.pipeline_mode<synchronous>, transform_indices = @transform_11, window_bounds = array<i64: 5, 1, 5>}, {pipeline_mode = #tpu.pipeline_mode<synchronous>, transform_indices = @transform_12, window_bounds = array<i64: 5, 80, 120>}, {pipeline_mode = #tpu.pipeline_mode<synchronous>, transform_indices = @transform_13, window_bounds = array<i64: 1, 120>}, {pipeline_mode = #tpu.pipeline_mode<synchronous>, transform_indices = @transform_14, window_bounds = array<i64: 120, 84>}, {pipeline_mode = #tpu.pipeline_mode<synchronous>, transform_indices = @transform_15, window_bounds = array<i64: 1, 84>}, {pipeline_mode = #tpu.pipeline_mode<synchronous>, transform_indices = @transform_16, window_bounds = array<i64: 84, 10>}, {pipeline_mode = #tpu.pipeline_mode<synchronous>, transform_indices = @transform_17, window_bounds = array<i64: 1, 10>}, {transform_indices = @transform_18, window_bounds = array<i64: 1, 1, 10>}]} {
    %c0 = arith.constant 0 : index
    %c0_0 = arith.constant 0 : index
    %c0_1 = arith.constant 0 : index
    %0 = vector.load %arg1[%c0, %c0_0, %c0_1] : memref<1x32x32xf32, #tpu.memory_space<vmem>>, vector<1x32x32xf32>
    %1 = vector.shape_cast %0 : vector<1x32x32xf32> to vector<32x32xf32>
    %c0_2 = arith.constant 0 : index
    %c0_3 = arith.constant 0 : index
    %c0_4 = arith.constant 0 : index
    %2 = vector.load %arg3[%c0_2, %c0_3, %c0_4] : memref<5x32x168xf32, #tpu.memory_space<vmem>>, vector<1x32x168xf32>
    %3 = vector.shape_cast %2 : vector<1x32x168xf32> to vector<32x168xf32>
    %cst = arith.constant dense<0.000000e+00> : vector<32x168xf32>
    %4 = tpu.matmul %1, %3, %cst {dimension_numbers = #tpu.dot_dimension_numbers<[1], [0], [0], [1], [0, 0, 1, 1], [], []>} : vector<32x32xf32>, vector<32x168xf32>, vector<32x168xf32> -> vector<32x168xf32>
    %c0_5 = arith.constant 0 : index
    %c0_6 = arith.constant 0 : index
    %c0_7 = arith.constant 0 : index
    %5 = vector.load %arg2[%c0_5, %c0_6, %c0_7] : memref<5x28x32xf32, #tpu.memory_space<vmem>>, vector<1x28x32xf32>
    %6 = vector.shape_cast %5 : vector<1x28x32xf32> to vector<28x32xf32>
    %cst_8 = arith.constant dense<0.000000e+00> : vector<28x168xf32>
    %7 = tpu.matmul %6, %4, %cst_8 {dimension_numbers = #tpu.dot_dimension_numbers<[1], [0], [0], [1], [0, 0, 1, 1], [], []>} : vector<28x32xf32>, vector<32x168xf32>, vector<28x168xf32> -> vector<28x168xf32>
    %c1 = arith.constant 1 : index
    %c0_9 = arith.constant 0 : index
    %c0_10 = arith.constant 0 : index
    %8 = vector.load %arg3[%c1, %c0_9, %c0_10] : memref<5x32x168xf32, #tpu.memory_space<vmem>>, vector<1x32x168xf32>
    %9 = vector.shape_cast %8 : vector<1x32x168xf32> to vector<32x168xf32>
    %cst_11 = arith.constant dense<0.000000e+00> : vector<32x168xf32>
    %10 = tpu.matmul %1, %9, %cst_11 {dimension_numbers = #tpu.dot_dimension_numbers<[1], [0], [0], [1], [0, 0, 1, 1], [], []>} : vector<32x32xf32>, vector<32x168xf32>, vector<32x168xf32> -> vector<32x168xf32>
    %c1_12 = arith.constant 1 : index
    %c0_13 = arith.constant 0 : index
    %c0_14 = arith.constant 0 : index
    %11 = vector.load %arg2[%c1_12, %c0_13, %c0_14] : memref<5x28x32xf32, #tpu.memory_space<vmem>>, vector<1x28x32xf32>
    %12 = vector.shape_cast %11 : vector<1x28x32xf32> to vector<28x32xf32>
    %cst_15 = arith.constant dense<0.000000e+00> : vector<28x168xf32>
    %13 = tpu.matmul %12, %10, %cst_15 {dimension_numbers = #tpu.dot_dimension_numbers<[1], [0], [0], [1], [0, 0, 1, 1], [], []>} : vector<28x32xf32>, vector<32x168xf32>, vector<28x168xf32> -> vector<28x168xf32>
    %14 = arith.addf %7, %13 : vector<28x168xf32>
    %c2 = arith.constant 2 : index
    %c0_16 = arith.constant 0 : index
    %c0_17 = arith.constant 0 : index
    %15 = vector.load %arg3[%c2, %c0_16, %c0_17] : memref<5x32x168xf32, #tpu.memory_space<vmem>>, vector<1x32x168xf32>
    %16 = vector.shape_cast %15 : vector<1x32x168xf32> to vector<32x168xf32>
    %cst_18 = arith.constant dense<0.000000e+00> : vector<32x168xf32>
    %17 = tpu.matmul %1, %16, %cst_18 {dimension_numbers = #tpu.dot_dimension_numbers<[1], [0], [0], [1], [0, 0, 1, 1], [], []>} : vector<32x32xf32>, vector<32x168xf32>, vector<32x168xf32> -> vector<32x168xf32>
    %c2_19 = arith.constant 2 : index
    %c0_20 = arith.constant 0 : index
    %c0_21 = arith.constant 0 : index
    %18 = vector.load %arg2[%c2_19, %c0_20, %c0_21] : memref<5x28x32xf32, #tpu.memory_space<vmem>>, vector<1x28x32xf32>
    %19 = vector.shape_cast %18 : vector<1x28x32xf32> to vector<28x32xf32>
    %cst_22 = arith.constant dense<0.000000e+00> : vector<28x168xf32>
    %20 = tpu.matmul %19, %17, %cst_22 {dimension_numbers = #tpu.dot_dimension_numbers<[1], [0], [0], [1], [0, 0, 1, 1], [], []>} : vector<28x32xf32>, vector<32x168xf32>, vector<28x168xf32> -> vector<28x168xf32>
    %21 = arith.addf %14, %20 : vector<28x168xf32>
    %c3 = arith.constant 3 : index
    %c0_23 = arith.constant 0 : index
    %c0_24 = arith.constant 0 : index
    %22 = vector.load %arg3[%c3, %c0_23, %c0_24] : memref<5x32x168xf32, #tpu.memory_space<vmem>>, vector<1x32x168xf32>
    %23 = vector.shape_cast %22 : vector<1x32x168xf32> to vector<32x168xf32>
    %cst_25 = arith.constant dense<0.000000e+00> : vector<32x168xf32>
    %24 = tpu.matmul %1, %23, %cst_25 {dimension_numbers = #tpu.dot_dimension_numbers<[1], [0], [0], [1], [0, 0, 1, 1], [], []>} : vector<32x32xf32>, vector<32x168xf32>, vector<32x168xf32> -> vector<32x168xf32>
    %c3_26 = arith.constant 3 : index
    %c0_27 = arith.constant 0 : index
    %c0_28 = arith.constant 0 : index
    %25 = vector.load %arg2[%c3_26, %c0_27, %c0_28] : memref<5x28x32xf32, #tpu.memory_space<vmem>>, vector<1x28x32xf32>
    %26 = vector.shape_cast %25 : vector<1x28x32xf32> to vector<28x32xf32>
    %cst_29 = arith.constant dense<0.000000e+00> : vector<28x168xf32>
    %27 = tpu.matmul %26, %24, %cst_29 {dimension_numbers = #tpu.dot_dimension_numbers<[1], [0], [0], [1], [0, 0, 1, 1], [], []>} : vector<28x32xf32>, vector<32x168xf32>, vector<28x168xf32> -> vector<28x168xf32>
    %28 = arith.addf %21, %27 : vector<28x168xf32>
    %c4 = arith.constant 4 : index
    %c0_30 = arith.constant 0 : index
    %c0_31 = arith.constant 0 : index
    %29 = vector.load %arg3[%c4, %c0_30, %c0_31] : memref<5x32x168xf32, #tpu.memory_space<vmem>>, vector<1x32x168xf32>
    %30 = vector.shape_cast %29 : vector<1x32x168xf32> to vector<32x168xf32>
    %cst_32 = arith.constant dense<0.000000e+00> : vector<32x168xf32>
    %31 = tpu.matmul %1, %30, %cst_32 {dimension_numbers = #tpu.dot_dimension_numbers<[1], [0], [0], [1], [0, 0, 1, 1], [], []>} : vector<32x32xf32>, vector<32x168xf32>, vector<32x168xf32> -> vector<32x168xf32>
    %c4_33 = arith.constant 4 : index
    %c0_34 = arith.constant 0 : index
    %c0_35 = arith.constant 0 : index
    %32 = vector.load %arg2[%c4_33, %c0_34, %c0_35] : memref<5x28x32xf32, #tpu.memory_space<vmem>>, vector<1x28x32xf32>
    %33 = vector.shape_cast %32 : vector<1x28x32xf32> to vector<28x32xf32>
    %cst_36 = arith.constant dense<0.000000e+00> : vector<28x168xf32>
    %34 = tpu.matmul %33, %31, %cst_36 {dimension_numbers = #tpu.dot_dimension_numbers<[1], [0], [0], [1], [0, 0, 1, 1], [], []>} : vector<28x32xf32>, vector<32x168xf32>, vector<28x168xf32> -> vector<28x168xf32>
    %35 = arith.addf %28, %34 : vector<28x168xf32>
    %c0_37 = arith.constant 0 : index
    %c0_38 = arith.constant 0 : index
    %36 = vector.load %arg4[%c0_37, %c0_38] : memref<1x168xf32, #tpu.memory_space<vmem>>, vector<1x168xf32>
    %37 = vector.broadcast %36 : vector<1x168xf32> to vector<28x168xf32>
    %38 = arith.addf %35, %37 : vector<28x168xf32>
    %cst_39 = arith.constant 0.000000e+00 : f32
    %39 = vector.broadcast %cst_39 : f32 to vector<28x168xf32>
    %40 = arith.maximumf %38, %39 : vector<28x168xf32>
    %c0_40 = arith.constant 0 : index
    %c0_41 = arith.constant 0 : index
    %41 = vector.load %arg5[%c0_40, %c0_41] : memref<14x28xf32, #tpu.memory_space<vmem>>, vector<14x28xf32>
    %cst_42 = arith.constant dense<0.000000e+00> : vector<14x168xf32>
    %42 = tpu.matmul %41, %40, %cst_42 {dimension_numbers = #tpu.dot_dimension_numbers<[1], [0], [0], [1], [0, 0, 1, 1], [], []>} : vector<14x28xf32>, vector<28x168xf32>, vector<14x168xf32> -> vector<14x168xf32>
    %c0_43 = arith.constant 0 : index
    %c0_44 = arith.constant 0 : index
    %43 = vector.load %arg6[%c0_43, %c0_44] : memref<168x84xf32, #tpu.memory_space<vmem>>, vector<168x84xf32>
    %cst_45 = arith.constant dense<0.000000e+00> : vector<14x84xf32>
    %44 = tpu.matmul %42, %43, %cst_45 {dimension_numbers = #tpu.dot_dimension_numbers<[1], [0], [0], [1], [0, 0, 1, 1], [], []>} : vector<14x168xf32>, vector<168x84xf32>, vector<14x84xf32> -> vector<14x84xf32>
    %c0_46 = arith.constant 0 : index
    %c0_47 = arith.constant 0 : index
    %c0_48 = arith.constant 0 : index
    %45 = vector.load %arg8[%c0_46, %c0_47, %c0_48] : memref<5x84x160xf32, #tpu.memory_space<vmem>>, vector<1x84x160xf32>
    %46 = vector.shape_cast %45 : vector<1x84x160xf32> to vector<84x160xf32>
    %cst_49 = arith.constant dense<0.000000e+00> : vector<14x160xf32>
    %47 = tpu.matmul %44, %46, %cst_49 {dimension_numbers = #tpu.dot_dimension_numbers<[1], [0], [0], [1], [0, 0, 1, 1], [], []>} : vector<14x84xf32>, vector<84x160xf32>, vector<14x160xf32> -> vector<14x160xf32>
    %c0_50 = arith.constant 0 : index
    %c0_51 = arith.constant 0 : index
    %c0_52 = arith.constant 0 : index
    %48 = vector.load %arg7[%c0_50, %c0_51, %c0_52] : memref<5x10x14xf32, #tpu.memory_space<vmem>>, vector<1x10x14xf32>
    %49 = vector.shape_cast %48 : vector<1x10x14xf32> to vector<10x14xf32>
    %cst_53 = arith.constant dense<0.000000e+00> : vector<10x160xf32>
    %50 = tpu.matmul %49, %47, %cst_53 {dimension_numbers = #tpu.dot_dimension_numbers<[1], [0], [0], [1], [0, 0, 1, 1], [], []>} : vector<10x14xf32>, vector<14x160xf32>, vector<10x160xf32> -> vector<10x160xf32>
    %c1_54 = arith.constant 1 : index
    %c0_55 = arith.constant 0 : index
    %c0_56 = arith.constant 0 : index
    %51 = vector.load %arg8[%c1_54, %c0_55, %c0_56] : memref<5x84x160xf32, #tpu.memory_space<vmem>>, vector<1x84x160xf32>
    %52 = vector.shape_cast %51 : vector<1x84x160xf32> to vector<84x160xf32>
    %cst_57 = arith.constant dense<0.000000e+00> : vector<14x160xf32>
    %53 = tpu.matmul %44, %52, %cst_57 {dimension_numbers = #tpu.dot_dimension_numbers<[1], [0], [0], [1], [0, 0, 1, 1], [], []>} : vector<14x84xf32>, vector<84x160xf32>, vector<14x160xf32> -> vector<14x160xf32>
    %c1_58 = arith.constant 1 : index
    %c0_59 = arith.constant 0 : index
    %c0_60 = arith.constant 0 : index
    %54 = vector.load %arg7[%c1_58, %c0_59, %c0_60] : memref<5x10x14xf32, #tpu.memory_space<vmem>>, vector<1x10x14xf32>
    %55 = vector.shape_cast %54 : vector<1x10x14xf32> to vector<10x14xf32>
    %cst_61 = arith.constant dense<0.000000e+00> : vector<10x160xf32>
    %56 = tpu.matmul %55, %53, %cst_61 {dimension_numbers = #tpu.dot_dimension_numbers<[1], [0], [0], [1], [0, 0, 1, 1], [], []>} : vector<10x14xf32>, vector<14x160xf32>, vector<10x160xf32> -> vector<10x160xf32>
    %57 = arith.addf %50, %56 : vector<10x160xf32>
    %c2_62 = arith.constant 2 : index
    %c0_63 = arith.constant 0 : index
    %c0_64 = arith.constant 0 : index
    %58 = vector.load %arg8[%c2_62, %c0_63, %c0_64] : memref<5x84x160xf32, #tpu.memory_space<vmem>>, vector<1x84x160xf32>
    %59 = vector.shape_cast %58 : vector<1x84x160xf32> to vector<84x160xf32>
    %cst_65 = arith.constant dense<0.000000e+00> : vector<14x160xf32>
    %60 = tpu.matmul %44, %59, %cst_65 {dimension_numbers = #tpu.dot_dimension_numbers<[1], [0], [0], [1], [0, 0, 1, 1], [], []>} : vector<14x84xf32>, vector<84x160xf32>, vector<14x160xf32> -> vector<14x160xf32>
    %c2_66 = arith.constant 2 : index
    %c0_67 = arith.constant 0 : index
    %c0_68 = arith.constant 0 : index
    %61 = vector.load %arg7[%c2_66, %c0_67, %c0_68] : memref<5x10x14xf32, #tpu.memory_space<vmem>>, vector<1x10x14xf32>
    %62 = vector.shape_cast %61 : vector<1x10x14xf32> to vector<10x14xf32>
    %cst_69 = arith.constant dense<0.000000e+00> : vector<10x160xf32>
    %63 = tpu.matmul %62, %60, %cst_69 {dimension_numbers = #tpu.dot_dimension_numbers<[1], [0], [0], [1], [0, 0, 1, 1], [], []>} : vector<10x14xf32>, vector<14x160xf32>, vector<10x160xf32> -> vector<10x160xf32>
    %64 = arith.addf %57, %63 : vector<10x160xf32>
    %c3_70 = arith.constant 3 : index
    %c0_71 = arith.constant 0 : index
    %c0_72 = arith.constant 0 : index
    %65 = vector.load %arg8[%c3_70, %c0_71, %c0_72] : memref<5x84x160xf32, #tpu.memory_space<vmem>>, vector<1x84x160xf32>
    %66 = vector.shape_cast %65 : vector<1x84x160xf32> to vector<84x160xf32>
    %cst_73 = arith.constant dense<0.000000e+00> : vector<14x160xf32>
    %67 = tpu.matmul %44, %66, %cst_73 {dimension_numbers = #tpu.dot_dimension_numbers<[1], [0], [0], [1], [0, 0, 1, 1], [], []>} : vector<14x84xf32>, vector<84x160xf32>, vector<14x160xf32> -> vector<14x160xf32>
    %c3_74 = arith.constant 3 : index
    %c0_75 = arith.constant 0 : index
    %c0_76 = arith.constant 0 : index
    %68 = vector.load %arg7[%c3_74, %c0_75, %c0_76] : memref<5x10x14xf32, #tpu.memory_space<vmem>>, vector<1x10x14xf32>
    %69 = vector.shape_cast %68 : vector<1x10x14xf32> to vector<10x14xf32>
    %cst_77 = arith.constant dense<0.000000e+00> : vector<10x160xf32>
    %70 = tpu.matmul %69, %67, %cst_77 {dimension_numbers = #tpu.dot_dimension_numbers<[1], [0], [0], [1], [0, 0, 1, 1], [], []>} : vector<10x14xf32>, vector<14x160xf32>, vector<10x160xf32> -> vector<10x160xf32>
    %71 = arith.addf %64, %70 : vector<10x160xf32>
    %c4_78 = arith.constant 4 : index
    %c0_79 = arith.constant 0 : index
    %c0_80 = arith.constant 0 : index
    %72 = vector.load %arg8[%c4_78, %c0_79, %c0_80] : memref<5x84x160xf32, #tpu.memory_space<vmem>>, vector<1x84x160xf32>
    %73 = vector.shape_cast %72 : vector<1x84x160xf32> to vector<84x160xf32>
    %cst_81 = arith.constant dense<0.000000e+00> : vector<14x160xf32>
    %74 = tpu.matmul %44, %73, %cst_81 {dimension_numbers = #tpu.dot_dimension_numbers<[1], [0], [0], [1], [0, 0, 1, 1], [], []>} : vector<14x84xf32>, vector<84x160xf32>, vector<14x160xf32> -> vector<14x160xf32>
    %c4_82 = arith.constant 4 : index
    %c0_83 = arith.constant 0 : index
    %c0_84 = arith.constant 0 : index
    %75 = vector.load %arg7[%c4_82, %c0_83, %c0_84] : memref<5x10x14xf32, #tpu.memory_space<vmem>>, vector<1x10x14xf32>
    %76 = vector.shape_cast %75 : vector<1x10x14xf32> to vector<10x14xf32>
    %cst_85 = arith.constant dense<0.000000e+00> : vector<10x160xf32>
    %77 = tpu.matmul %76, %74, %cst_85 {dimension_numbers = #tpu.dot_dimension_numbers<[1], [0], [0], [1], [0, 0, 1, 1], [], []>} : vector<10x14xf32>, vector<14x160xf32>, vector<10x160xf32> -> vector<10x160xf32>
    %78 = arith.addf %71, %77 : vector<10x160xf32>
    %c0_86 = arith.constant 0 : index
    %c0_87 = arith.constant 0 : index
    %79 = vector.load %arg9[%c0_86, %c0_87] : memref<1x160xf32, #tpu.memory_space<vmem>>, vector<1x160xf32>
    %80 = vector.broadcast %79 : vector<1x160xf32> to vector<10x160xf32>
    %81 = arith.addf %78, %80 : vector<10x160xf32>
    %cst_88 = arith.constant 0.000000e+00 : f32
    %82 = vector.broadcast %cst_88 : f32 to vector<10x160xf32>
    %83 = arith.maximumf %81, %82 : vector<10x160xf32>
    %c0_89 = arith.constant 0 : index
    %c0_90 = arith.constant 0 : index
    %84 = vector.load %arg10[%c0_89, %c0_90] : memref<5x10xf32, #tpu.memory_space<vmem>>, vector<5x10xf32>
    %cst_91 = arith.constant dense<0.000000e+00> : vector<5x160xf32>
    %85 = tpu.matmul %84, %83, %cst_91 {dimension_numbers = #tpu.dot_dimension_numbers<[1], [0], [0], [1], [0, 0, 1, 1], [], []>} : vector<5x10xf32>, vector<10x160xf32>, vector<5x160xf32> -> vector<5x160xf32>
    %c0_92 = arith.constant 0 : index
    %c0_93 = arith.constant 0 : index
    %86 = vector.load %arg11[%c0_92, %c0_93] : memref<160x80xf32, #tpu.memory_space<vmem>>, vector<160x80xf32>
    %cst_94 = arith.constant dense<0.000000e+00> : vector<5x80xf32>
    %87 = tpu.matmul %85, %86, %cst_94 {dimension_numbers = #tpu.dot_dimension_numbers<[1], [0], [0], [1], [0, 0, 1, 1], [], []>} : vector<5x160xf32>, vector<160x80xf32>, vector<5x80xf32> -> vector<5x80xf32>
    %c0_95 = arith.constant 0 : index
    %c0_96 = arith.constant 0 : index
    %c0_97 = arith.constant 0 : index
    %88 = vector.load %arg13[%c0_95, %c0_96, %c0_97] : memref<5x80x120xf32, #tpu.memory_space<vmem>>, vector<1x80x120xf32>
    %89 = vector.shape_cast %88 : vector<1x80x120xf32> to vector<80x120xf32>
    %cst_98 = arith.constant dense<0.000000e+00> : vector<5x120xf32>
    %90 = tpu.matmul %87, %89, %cst_98 {dimension_numbers = #tpu.dot_dimension_numbers<[1], [0], [0], [1], [0, 0, 1, 1], [], []>} : vector<5x80xf32>, vector<80x120xf32>, vector<5x120xf32> -> vector<5x120xf32>
    %c0_99 = arith.constant 0 : index
    %c0_100 = arith.constant 0 : index
    %c0_101 = arith.constant 0 : index
    %91 = vector.load %arg12[%c0_99, %c0_100, %c0_101] : memref<5x1x5xf32, #tpu.memory_space<vmem>>, vector<1x1x5xf32>
    %92 = vector.shape_cast %91 : vector<1x1x5xf32> to vector<1x5xf32>
    %cst_102 = arith.constant dense<0.000000e+00> : vector<1x120xf32>
    %93 = tpu.matmul %92, %90, %cst_102 {dimension_numbers = #tpu.dot_dimension_numbers<[1], [0], [0], [1], [0, 0, 1, 1], [], []>} : vector<1x5xf32>, vector<5x120xf32>, vector<1x120xf32> -> vector<1x120xf32>
    %c1_103 = arith.constant 1 : index
    %c0_104 = arith.constant 0 : index
    %c0_105 = arith.constant 0 : index
    %94 = vector.load %arg13[%c1_103, %c0_104, %c0_105] : memref<5x80x120xf32, #tpu.memory_space<vmem>>, vector<1x80x120xf32>
    %95 = vector.shape_cast %94 : vector<1x80x120xf32> to vector<80x120xf32>
    %cst_106 = arith.constant dense<0.000000e+00> : vector<5x120xf32>
    %96 = tpu.matmul %87, %95, %cst_106 {dimension_numbers = #tpu.dot_dimension_numbers<[1], [0], [0], [1], [0, 0, 1, 1], [], []>} : vector<5x80xf32>, vector<80x120xf32>, vector<5x120xf32> -> vector<5x120xf32>
    %c1_107 = arith.constant 1 : index
    %c0_108 = arith.constant 0 : index
    %c0_109 = arith.constant 0 : index
    %97 = vector.load %arg12[%c1_107, %c0_108, %c0_109] : memref<5x1x5xf32, #tpu.memory_space<vmem>>, vector<1x1x5xf32>
    %98 = vector.shape_cast %97 : vector<1x1x5xf32> to vector<1x5xf32>
    %cst_110 = arith.constant dense<0.000000e+00> : vector<1x120xf32>
    %99 = tpu.matmul %98, %96, %cst_110 {dimension_numbers = #tpu.dot_dimension_numbers<[1], [0], [0], [1], [0, 0, 1, 1], [], []>} : vector<1x5xf32>, vector<5x120xf32>, vector<1x120xf32> -> vector<1x120xf32>
    %100 = arith.addf %93, %99 : vector<1x120xf32>
    %c2_111 = arith.constant 2 : index
    %c0_112 = arith.constant 0 : index
    %c0_113 = arith.constant 0 : index
    %101 = vector.load %arg13[%c2_111, %c0_112, %c0_113] : memref<5x80x120xf32, #tpu.memory_space<vmem>>, vector<1x80x120xf32>
    %102 = vector.shape_cast %101 : vector<1x80x120xf32> to vector<80x120xf32>
    %cst_114 = arith.constant dense<0.000000e+00> : vector<5x120xf32>
    %103 = tpu.matmul %87, %102, %cst_114 {dimension_numbers = #tpu.dot_dimension_numbers<[1], [0], [0], [1], [0, 0, 1, 1], [], []>} : vector<5x80xf32>, vector<80x120xf32>, vector<5x120xf32> -> vector<5x120xf32>
    %c2_115 = arith.constant 2 : index
    %c0_116 = arith.constant 0 : index
    %c0_117 = arith.constant 0 : index
    %104 = vector.load %arg12[%c2_115, %c0_116, %c0_117] : memref<5x1x5xf32, #tpu.memory_space<vmem>>, vector<1x1x5xf32>
    %105 = vector.shape_cast %104 : vector<1x1x5xf32> to vector<1x5xf32>
    %cst_118 = arith.constant dense<0.000000e+00> : vector<1x120xf32>
    %106 = tpu.matmul %105, %103, %cst_118 {dimension_numbers = #tpu.dot_dimension_numbers<[1], [0], [0], [1], [0, 0, 1, 1], [], []>} : vector<1x5xf32>, vector<5x120xf32>, vector<1x120xf32> -> vector<1x120xf32>
    %107 = arith.addf %100, %106 : vector<1x120xf32>
    %c3_119 = arith.constant 3 : index
    %c0_120 = arith.constant 0 : index
    %c0_121 = arith.constant 0 : index
    %108 = vector.load %arg13[%c3_119, %c0_120, %c0_121] : memref<5x80x120xf32, #tpu.memory_space<vmem>>, vector<1x80x120xf32>
    %109 = vector.shape_cast %108 : vector<1x80x120xf32> to vector<80x120xf32>
    %cst_122 = arith.constant dense<0.000000e+00> : vector<5x120xf32>
    %110 = tpu.matmul %87, %109, %cst_122 {dimension_numbers = #tpu.dot_dimension_numbers<[1], [0], [0], [1], [0, 0, 1, 1], [], []>} : vector<5x80xf32>, vector<80x120xf32>, vector<5x120xf32> -> vector<5x120xf32>
    %c3_123 = arith.constant 3 : index
    %c0_124 = arith.constant 0 : index
    %c0_125 = arith.constant 0 : index
    %111 = vector.load %arg12[%c3_123, %c0_124, %c0_125] : memref<5x1x5xf32, #tpu.memory_space<vmem>>, vector<1x1x5xf32>
    %112 = vector.shape_cast %111 : vector<1x1x5xf32> to vector<1x5xf32>
    %cst_126 = arith.constant dense<0.000000e+00> : vector<1x120xf32>
    %113 = tpu.matmul %112, %110, %cst_126 {dimension_numbers = #tpu.dot_dimension_numbers<[1], [0], [0], [1], [0, 0, 1, 1], [], []>} : vector<1x5xf32>, vector<5x120xf32>, vector<1x120xf32> -> vector<1x120xf32>
    %114 = arith.addf %107, %113 : vector<1x120xf32>
    %c4_127 = arith.constant 4 : index
    %c0_128 = arith.constant 0 : index
    %c0_129 = arith.constant 0 : index
    %115 = vector.load %arg13[%c4_127, %c0_128, %c0_129] : memref<5x80x120xf32, #tpu.memory_space<vmem>>, vector<1x80x120xf32>
    %116 = vector.shape_cast %115 : vector<1x80x120xf32> to vector<80x120xf32>
    %cst_130 = arith.constant dense<0.000000e+00> : vector<5x120xf32>
    %117 = tpu.matmul %87, %116, %cst_130 {dimension_numbers = #tpu.dot_dimension_numbers<[1], [0], [0], [1], [0, 0, 1, 1], [], []>} : vector<5x80xf32>, vector<80x120xf32>, vector<5x120xf32> -> vector<5x120xf32>
    %c4_131 = arith.constant 4 : index
    %c0_132 = arith.constant 0 : index
    %c0_133 = arith.constant 0 : index
    %118 = vector.load %arg12[%c4_131, %c0_132, %c0_133] : memref<5x1x5xf32, #tpu.memory_space<vmem>>, vector<1x1x5xf32>
    %119 = vector.shape_cast %118 : vector<1x1x5xf32> to vector<1x5xf32>
    %cst_134 = arith.constant dense<0.000000e+00> : vector<1x120xf32>
    %120 = tpu.matmul %119, %117, %cst_134 {dimension_numbers = #tpu.dot_dimension_numbers<[1], [0], [0], [1], [0, 0, 1, 1], [], []>} : vector<1x5xf32>, vector<5x120xf32>, vector<1x120xf32> -> vector<1x120xf32>
    %121 = arith.addf %114, %120 : vector<1x120xf32>
    %c0_135 = arith.constant 0 : index
    %c0_136 = arith.constant 0 : index
    %122 = vector.load %arg14[%c0_135, %c0_136] : memref<1x120xf32, #tpu.memory_space<vmem>>, vector<1x120xf32>
    %123 = arith.addf %121, %122 : vector<1x120xf32>
    %cst_137 = arith.constant 0.000000e+00 : f32
    %124 = vector.broadcast %cst_137 : f32 to vector<1x120xf32>
    %125 = arith.maximumf %123, %124 : vector<1x120xf32>
    %c0_138 = arith.constant 0 : index
    %c0_139 = arith.constant 0 : index
    %126 = vector.load %arg15[%c0_138, %c0_139] : memref<120x84xf32, #tpu.memory_space<vmem>>, vector<120x84xf32>
    %cst_140 = arith.constant dense<0.000000e+00> : vector<1x84xf32>
    %127 = tpu.matmul %125, %126, %cst_140 {dimension_numbers = #tpu.dot_dimension_numbers<[1], [0], [0], [1], [0, 0, 1, 1], [], []>} : vector<1x120xf32>, vector<120x84xf32>, vector<1x84xf32> -> vector<1x84xf32>
    %c0_141 = arith.constant 0 : index
    %c0_142 = arith.constant 0 : index
    %128 = vector.load %arg16[%c0_141, %c0_142] : memref<1x84xf32, #tpu.memory_space<vmem>>, vector<1x84xf32>
    %129 = arith.addf %127, %128 : vector<1x84xf32>
    %cst_143 = arith.constant 0.000000e+00 : f32
    %130 = vector.broadcast %cst_143 : f32 to vector<1x84xf32>
    %131 = arith.maximumf %129, %130 : vector<1x84xf32>
    %c0_144 = arith.constant 0 : index
    %c0_145 = arith.constant 0 : index
    %132 = vector.load %arg17[%c0_144, %c0_145] : memref<84x10xf32, #tpu.memory_space<vmem>>, vector<84x10xf32>
    %cst_146 = arith.constant dense<0.000000e+00> : vector<1x10xf32>
    %133 = tpu.matmul %131, %132, %cst_146 {dimension_numbers = #tpu.dot_dimension_numbers<[1], [0], [0], [1], [0, 0, 1, 1], [], []>} : vector<1x84xf32>, vector<84x10xf32>, vector<1x10xf32> -> vector<1x10xf32>
    %c0_147 = arith.constant 0 : index
    %c0_148 = arith.constant 0 : index
    %134 = vector.load %arg18[%c0_147, %c0_148] : memref<1x10xf32, #tpu.memory_space<vmem>>, vector<1x10xf32>
    %135 = arith.addf %133, %134 : vector<1x10xf32>
    %c0_149 = arith.constant 0 : index
    %c0_150 = arith.constant 0 : index
    %c0_151 = arith.constant 0 : index
    %136 = vector.load %arg19[%c0_149, %c0_150, %c0_151] : memref<1x1x10xf32, #tpu.memory_space<vmem>>, vector<1x1x10xf32>
    %137 = vector.shape_cast %136 : vector<1x1x10xf32> to vector<1x10xf32>
    %138 = vector.shape_cast %135 : vector<1x10xf32> to vector<1x1x10xf32>
    tpu.vector_store %arg19[%c0_149, %c0_150, %c0_151], %138 {strides = array<i32>} : memref<1x1x10xf32, #tpu.memory_space<vmem>>, vector<1x1x10xf32>,
    return
  }
  func.func @transform_0(%arg0: i32) -> (i32, i32, i32) {
    %c0_i32 = arith.constant 0 : i32
    %c0_i32_0 = arith.constant 0 : i32
    %c0_i32_1 = arith.constant 0 : i32
    return %arg0, %c0_i32, %c0_i32_0 : i32, i32, i32
  }
  func.func @transform_1(%arg0: i32) -> (i32, i32, i32) {
    %c0_i32 = arith.constant 0 : i32
    %c0_i32_0 = arith.constant 0 : i32
    %c0_i32_1 = arith.constant 0 : i32
    %c0_i32_2 = arith.constant 0 : i32
    return %c0_i32, %c0_i32_0, %c0_i32_1 : i32, i32, i32
  }
  func.func @transform_2(%arg0: i32) -> (i32, i32, i32) {
    %c0_i32 = arith.constant 0 : i32
    %c0_i32_0 = arith.constant 0 : i32
    %c0_i32_1 = arith.constant 0 : i32
    %c0_i32_2 = arith.constant 0 : i32
    return %c0_i32, %c0_i32_0, %c0_i32_1 : i32, i32, i32
  }
  func.func @transform_3(%arg0: i32) -> (i32, i32) {
    %c0_i32 = arith.constant 0 : i32
    %c0_i32_0 = arith.constant 0 : i32
    %c0_i32_1 = arith.constant 0 : i32
    return %c0_i32, %c0_i32_0 : i32, i32
  }
  func.func @transform_4(%arg0: i32) -> (i32, i32) {
    %c0_i32 = arith.constant 0 : i32
    %c0_i32_0 = arith.constant 0 : i32
    %c0_i32_1 = arith.constant 0 : i32
    return %c0_i32, %c0_i32_0 : i32, i32
  }
  func.func @transform_5(%arg0: i32) -> (i32, i32) {
    %c0_i32 = arith.constant 0 : i32
    %c0_i32_0 = arith.constant 0 : i32
    %c0_i32_1 = arith.constant 0 : i32
    return %c0_i32, %c0_i32_0 : i32, i32
  }
  func.func @transform_6(%arg0: i32) -> (i32, i32, i32) {
    %c0_i32 = arith.constant 0 : i32
    %c0_i32_0 = arith.constant 0 : i32
    %c0_i32_1 = arith.constant 0 : i32
    %c0_i32_2 = arith.constant 0 : i32
    return %c0_i32, %c0_i32_0, %c0_i32_1 : i32, i32, i32
  }
  func.func @transform_7(%arg0: i32) -> (i32, i32, i32) {
    %c0_i32 = arith.constant 0 : i32
    %c0_i32_0 = arith.constant 0 : i32
    %c0_i32_1 = arith.constant 0 : i32
    %c0_i32_2 = arith.constant 0 : i32
    return %c0_i32, %c0_i32_0, %c0_i32_1 : i32, i32, i32
  }
  func.func @transform_8(%arg0: i32) -> (i32, i32) {
    %c0_i32 = arith.constant 0 : i32
    %c0_i32_0 = arith.constant 0 : i32
    %c0_i32_1 = arith.constant 0 : i32
    return %c0_i32, %c0_i32_0 : i32, i32
  }
  func.func @transform_9(%arg0: i32) -> (i32, i32) {
    %c0_i32 = arith.constant 0 : i32
    %c0_i32_0 = arith.constant 0 : i32
    %c0_i32_1 = arith.constant 0 : i32
    return %c0_i32, %c0_i32_0 : i32, i32
  }
  func.func @transform_10(%arg0: i32) -> (i32, i32) {
    %c0_i32 = arith.constant 0 : i32
    %c0_i32_0 = arith.constant 0 : i32
    %c0_i32_1 = arith.constant 0 : i32
    return %c0_i32, %c0_i32_0 : i32, i32
  }
  func.func @transform_11(%arg0: i32) -> (i32, i32, i32) {
    %c0_i32 = arith.constant 0 : i32
    %c0_i32_0 = arith.constant 0 : i32
    %c0_i32_1 = arith.constant 0 : i32
    %c0_i32_2 = arith.constant 0 : i32
    return %c0_i32, %c0_i32_0, %c0_i32_1 : i32, i32, i32
  }
  func.func @transform_12(%arg0: i32) -> (i32, i32, i32) {
    %c0_i32 = arith.constant 0 : i32
    %c0_i32_0 = arith.constant 0 : i32
    %c0_i32_1 = arith.constant 0 : i32
    %c0_i32_2 = arith.constant 0 : i32
    return %c0_i32, %c0_i32_0, %c0_i32_1 : i32, i32, i32
  }
  func.func @transform_13(%arg0: i32) -> (i32, i32) {
    %c0_i32 = arith.constant 0 : i32
    %c0_i32_0 = arith.constant 0 : i32
    %c0_i32_1 = arith.constant 0 : i32
    return %c0_i32, %c0_i32_0 : i32, i32
  }
  func.func @transform_14(%arg0: i32) -> (i32, i32) {
    %c0_i32 = arith.constant 0 : i32
    %c0_i32_0 = arith.constant 0 : i32
    %c0_i32_1 = arith.constant 0 : i32
    return %c0_i32, %c0_i32_0 : i32, i32
  }
  func.func @transform_15(%arg0: i32) -> (i32, i32) {
    %c0_i32 = arith.constant 0 : i32
    %c0_i32_0 = arith.constant 0 : i32
    %c0_i32_1 = arith.constant 0 : i32
    return %c0_i32, %c0_i32_0 : i32, i32
  }
  func.func @transform_16(%arg0: i32) -> (i32, i32) {
    %c0_i32 = arith.constant 0 : i32
    %c0_i32_0 = arith.constant 0 : i32
    %c0_i32_1 = arith.constant 0 : i32
    return %c0_i32, %c0_i32_0 : i32, i32
  }
  func.func @transform_17(%arg0: i32) -> (i32, i32) {
    %c0_i32 = arith.constant 0 : i32
    %c0_i32_0 = arith.constant 0 : i32
    %c0_i32_1 = arith.constant 0 : i32
    return %c0_i32, %c0_i32_0 : i32, i32
  }
  func.func @transform_18(%arg0: i32) -> (i32, i32, i32) {
    %c0_i32 = arith.constant 0 : i32
    %c0_i32_0 = arith.constant 0 : i32
    %c0_i32_1 = arith.constant 0 : i32
    return %arg0, %c0_i32, %c0_i32_0 : i32, i32, i32
  }
}

</mosaic_0001>

<bundles_post_ra>
// kernel: lenet5_forward.1
= control target key start
LH: loop header
LB: loop body
LE: loop exit
PB: predicated region body
PF: predicated region fallthrough
CT: control target
= control target key end

     0   :  { %s6718_s0 = inlined_call_operand.vmem [shape: f32[2,32,32], index: 0, kind: input, shape index: {}]   ;;  %s6719_s1 = inlined_call_operand.vmem [shape: f32[5,28,32], index: 1, kind: input, shape index: {}]   ;;  %s6720_s2 = inlined_call_operand.vmem [shape: f32[5,32,168], index: 2, kind: input, shape index: {}]   ;;  %s6721_s3 = inlined_call_operand.vmem [shape: f32[1,168], index: 3, kind: input, shape index: {}]   ;;  %s6722_s4 = inlined_call_operand.vmem [shape: f32[14,28], index: 4, kind: input, shape index: {}]   ;;  %s6723_s5 = inlined_call_operand.vmem [shape: f32[168,84], index: 5, kind: input, shape index: {}]   ;;  %s6724_s6 = inlined_call_operand.vmem [shape: f32[5,10,14], index: 6, kind: input, shape index: {}]   ;;  %s6725_s7 = inlined_call_operand.vmem [shape: f32[5,84,160], index: 7, kind: input, shape index: {}]   ;;  %s6726_s8 = inlined_call_operand.vmem [shape: f32[1,160], index: 8, kind: input, shape index: {}]   ;;  %s6727_s9 = inlined_call_operand.vmem [shape: f32[5,10], index: 9, kind: input, shape index: {}]   ;;  %s6728_s10 = inlined_call_operand.vmem [shape: f32[160,80], index: 10, kind: input, shape index: {}]   ;;  %s6729_s11 = inlined_call_operand.vmem [shape: f32[5,1,5], index: 11, kind: input, shape index: {}]   ;;  %s6730_s12 = inlined_call_operand.vmem [shape: f32[5,80,120], index: 12, kind: input, shape index: {}]   ;;  %s6731_s13 = inlined_call_operand.vmem [shape: f32[1,120], index: 13, kind: input, shape index: {}]   ;;  %s6732_s14 = inlined_call_operand.vmem [shape: f32[120,84], index: 14, kind: input, shape index: {}]   ;;  %s6733_s15 = inlined_call_operand.vmem [shape: f32[1,84], index: 15, kind: input, shape index: {}]   ;;  %s6734_s16 = inlined_call_operand.vmem [shape: f32[84,10], index: 16, kind: input, shape index: {}]   ;;  %s6735_s17 = inlined_call_operand.vmem [shape: f32[1,10], index: 17, kind: input, shape index: {}]   ;;  %s6736_s18 = inlined_call_operand.hbm [shape: f32[2,1,10], index: 18, kind: output, shape index: {}]  }
   0x1   :  { %6746 = sst [smem:[#allocation11_spill]] %s6718_s0 }
   0x2   :  { %6747 = sst [smem:[#allocation12_spill]] %s6719_s1 }
   0x3   :  { %6748 = sst [smem:[#allocation13_spill]] %s6720_s2 }
   0x4   :  { %6749 = sst [smem:[#allocation14_spill]] %s6735_s17 }
   0x5   :  { %6750 = sst [smem:[#allocation15_spill]] %s6736_s18 }
   0x6   :  { %23 = vsyncpa [#allocation3], 0 }
   0x7   :  { %25 = vsyncpa [#allocation3 + $0x1], 0  ;;  %s5364_s27 = smov 0   ;;  %s5366_s28 = smov 0  }
   0x8   :  { %s5368_s29 = smov 0   ;;  %s5370_s30 = smov 0  }
   0x9 LB: > { %6751 = sst [smem:[#allocation5_spill]] %s5250_s27  ;;  %s5385_s0 = sadd.s32 4294967295, %s5262_s30   ;;  %s5262_s30 = sphi %s5370_s30, %s6769_s30   ;;  %s5258_s29 = sphi %s5368_s29, %s6771_s29   ;;  %s5254_s28 = sphi %s5366_s28, %s6773_s28   ;;  %s5250_s27 = sphi %s5364_s27, %s6772_s27  }
   0xa   : > { %6752 = sst [smem:[#allocation6_spill]] %s5258_s29  ;;  %s4115_s19 = sadd.s32 4294967294, %s5262_s30  }
   0xb   : > { %6753 = sst [smem:[#allocation7_spill]] %s5262_s30  ;;  %s5389_s1 = sadd.s32 1, %s5262_s30  }
   0xc   : > { %6754 = sst [smem:[#allocation8_spill]] %s5389_s1  ;;  %s421_s20 = sadd.s32 1, %s5258_s29 }
   0xd   : > { %s418_s21 = ssub.s32 %s5262_s30, %s5389_s1  ;;  %p431_p0 = scmp.ne.s32.totalorder %s5258_s29, %s5254_s28 }
   0xe   : > { %p419_p1 = scmp.eq.s32.totalorder %s418_s21, 0  ;;  %p432_p2 = scmp.eq.s32.totalorder %s5385_s0, 1 }
   0xf   : > { %p437_p3 = scmp.ne.s32.totalorder %s5254_s28, %s5250_s27  ;;  %p438_p4 = scmp.eq.s32.totalorder %s4115_s19, 1 }
  0x10   : > { %s5400_s22 = scalar_select %p419_p1, %s5258_s29, %s421_s20  }
  0x11   : > { %p5402_p5 = por %p432_p2, %p431_p0  ;;  %p5406_p6 = por %p438_p4, %p437_p3 }
  0x12   : > { %6755 = sst [smem:[#allocation9_spill]] %s5400_s22  ;;  %p4118_p7 = scmp.ge.s32.totalorder %s5262_s30, 1 }
  0x13   : > { %s6757_s23 = scalar_select %p5406_p6, 1, 0 }
  0x14   : > { %p515_p8 = scmp.lt.s32.totalorder %s5262_s30, 3 }
  0x15   : > { %6758 = sst [smem:[#allocation10_spill]] %s6757_s23 }
  0x16   : > { %p516_p9 = pnand %p4118_p7, %p515_p8 }
  0x17   : > { %s6759_s26 = sld [smem:[#allocation13_spill]] (!%p516_p9)  ;;  %p568_p10 = scmp.lt.s32.totalorder (!%p516_p9), %s5385_s0, 1  ;;  %v5264_v7 = vmov (!%p516_p9), 0.0   ;;  %vm585_vm0 = vcmask (!%p516_p9), 261120   ;;  %vm1669_vm1 = vcmask (!%p516_p9), 1043456   ;;  %vm5265_vm2 = vmmov (!%p516_p9), 1  }
  0x18   : > { %519 = sbr.rel (%p516_p9) target bundleno = 3315 (0xcf3), region = 92  ;;  %764 = vmatprep.mubr.f32.mxu1 (!%p516_p9), %v5264_v7  ;;  %662 = vmatprep.mubr.f32.mxu0 (!%p516_p9), %v5264_v7  ;;  %s6760_s19 = sld [smem:[#allocation11_spill]] (!%p516_p9)  ;;  %vm4797_vm3 = vmpackc.low (!%p516_p9), %vm1669_vm1, %vm5265_vm2  ;;  %vm1662_vm4 = vcmask (!%p516_p9), 228352   ;;  %vm1774_vm5 = vcmask (!%p516_p9), 326656   ;;  %vm1878_vm6 = vcmask (!%p516_p9), 687104   ;;  %vm2086_vm7 = vcmask (!%p516_p9), 1045504  }
  0x19   : > { %s6761_s1 = sld [smem:[#allocation12_spill]] (!%p516_p9)  ;;  %vm6095_vm8 = vmpackc.low (!%p516_p9), %vm2086_vm7, %vm5265_vm2  ;;  %vm2079_vm9 = vcmask (!%p516_p9), 113664   ;;  %vm2890_vm10 = vcmask (!%p516_p9), 1041408   ;;  %vm2886_vm12 = vcmask (!%p516_p9), 80896   ;;  %vm5267_vm13 = vmmov (!%p516_p9), 0   ;;  %s566_s17 = sand.u32 (!%p516_p9), 1, %s5254_s28  }
  0x1a   : > { %vm4963_vm11 = vmpackc.low (!%p516_p9), %vm2890_vm10, %vm5265_vm2  ;;  %vm3071_vm14 = vcmask (!%p516_p9), 654336   ;;  %vm3233_vm15 = vcmask (!%p516_p9), 1044480   ;;  %vm3882_vm2 = vcmask (!%p516_p9), 982016   ;;  %s4417_s23 = sshll.u32 (!%p516_p9), %s5385_s0, 4  ;;  %s567_s20 = scalar_lea.vmem (!%p516_p9), [#allocation2], %s566_s17 }
  0x1b   : > { %s4060_s21 = sshll.u32 (!%p516_p9), %s567_s20, 4  ;;  %s6765_s24 = sld [smem:[#allocation15_spill]] (!%p516_p9)  ;;  %s6678_s21 = int_to_ptr.vmem [resolvable:$true] %s4060_s21 }
  0x1c   : > { %s4048_s25 = scalar_lea.sflag (!%p516_p9), [#allocation3], %s566_s17  ;;  %s5200_s22 = scalar_lea.vmem (!%p516_p9), %s6678_s21, 16 }
  0x1d   : > { %v4126_v0 = vld [vmem:[%s6759_s26 + $0x48] sm:$0xff] (!%p516_p9)  ;;  %v4128_v1 = vld [vmem:[%s6759_s26 + $0x58] sm:$0xff] (!%p516_p9)  ;;  %v4125_v2 = vld [vmem:[%s6759_s26 + $0x40] sm:$0xff] (!%p516_p9)  ;;  %p5201_p11 = scmp.ne.s32.totalorder (!%p516_p9), %s6678_s21, %s5200_s22 }
  0x1e   : > { %v4720_v3 = vpack.c.bf16 (!%p516_p9), %v4128_v1, %v4126_v0  ;;  %v4127_v4 = vld [vmem:[%s6759_s26 + $0x50] sm:$0xff] (!%p516_p9)  ;;  %v4130_v5 = vld [vmem:[%s6759_s26 + $0x68] sm:$0xff] (!%p516_p9)  ;;  %v4132_v6 = vld [vmem:[%s6759_s26 + $0x78] sm:$0xff] (!%p516_p9) }
  0x1f   : > { %v4722_v8 = vpack.c.bf16 %v4127_v4, %v4125_v2  ;;  %v4724_v9 = vpack.c.bf16 %v4132_v6, %v4130_v5  ;;  %v4129_v10 = vld [vmem:[%s6759_s26 + $0x60] sm:$0xff]  ;;  %v4131_v11 = vld [vmem:[%s6759_s26 + $0x70] sm:$0xff]  ;;  %s569_s27 = scalar_select %p568_p10, %s5385_s0, 1  ;;  %v578_v12 = vld [vmem:[%s6759_s26 + $0x8] sm:$0xff] }
  0x20   : > { %4721 = vmatprep.subr.bf16.mxu1 %v4720_v3  ;;  %v580_v13 = vld [vmem:[%s6759_s26 + $0x18] sm:$0xff]  ;;  %v577_v14 = vld [vmem:[%s6759_s26] sm:$0xff]  ;;  %v579_v15 = vld [vmem:[%s6759_s26 + $0x10] sm:$0xff]  ;;  %v4726_v16 = vpack.c.bf16 %v4131_v11, %v4129_v10  ;;  %p5202_p12 = pnand %p5201_p11, %p5402_p5  ;;  %s5268_s0 = smov [#allocation2]  }
  0x21   : > { %4723 = vmatpush1.bf16.msra.mxu1 %v4722_v8  ;;  %s4420_s29 = sshll.u32 %s569_s27, 5  ;;  %v4712_v17 = vpack.c.bf16 %v580_v13, %v578_v12  ;;  %v4714_v18 = vpack.c.bf16 %v579_v15, %v577_v14  ;;  %v582_v19 = vld [vmem:[%s6759_s26 + $0x28] sm:$0xff]  ;;  %v584_v20 = vld [vmem:[%s6759_s26 + $0x38] sm:$0xff]  ;;  %v581_v21 = vld [vmem:[%s6759_s26 + $0x20] sm:$0xff]  ;;  %s6764_s27 = sld [smem:[#allocation14_spill]] }
  0x22   : > { %4725 = vmatprep.subr.bf16.mxu1 %v4724_v9  ;;  %s5464_s18 = scalar_lea.vmem %s6760_s19, %s4420_s29  ;;  %v4716_v22 = vpack.c.bf16 %v584_v20, %v582_v19  ;;  %v583_v23 = vld [vmem:[%s6759_s26 + $0x30] sm:$0xff]  ;;  %v4150_v24 = vld [vmem:[%s6759_s26 + $0x88] sm:$0xff]  ;;  %v4152_v25 = vld [vmem:[%s6759_s26 + $0x98] sm:$0xff]  ;;  %s6676_s30 = scalar_lea.hbm %s6765_s24, %s4417_s23 }
  0x23   : > { %4713 = vmatprep.subr.bf16.mxu0 %v4712_v17  ;;  %v4744_v26 = vpack.c.bf16 %v4152_v25, %v4150_v24  ;;  %v4718_v27 = vpack.c.bf16 %v583_v23, %v581_v21  ;;  %v4149_v28 = vld [vmem:[%s6759_s26 + $0x80] sm:$0xff]  ;;  %v4151_v29 = vld [vmem:[%s6759_s26 + $0x90] sm:$0xff]  ;;  %v4154_v32 = vld [vmem:[%s6759_s26 + $0xa8] sm:$0xff]  ;;  %p5203_p13 = pneg %p5202_p12  ;;  %s5204_s19 = sshll.u32 %s5268_s0, 4  ;;  %s5205_s19 = int_to_ptr.vmem [resolvable:$false] %s5204_s19 }
  0x24   : > { %4715 = vmatpush1.bf16.msra.mxu0 %v4714_v18  ;;  %v5482_v30 = vld [vmem:[%s5464_s18] sm:$0xff]  ;;  %v4746_v31 = vpack.c.bf16 %v4151_v29, %v4149_v28  ;;  %v4156_v33 = vld [vmem:[%s6759_s26 + $0xb8] sm:$0xff]  ;;  %v4155_v36 = vld [vmem:[%s6759_s26 + $0xb0] sm:$0xff]  ;;  %p5207_p0 = scmp.lt.s32.totalorder %s6678_s21, %s5205_s19 }
  0x25   : > { %4727 = vmatpush1.bf16.msra.mxu1 %v4726_v16  ;;  %4717 = vmatprep.subr.bf16.mxu0 %v4716_v22  ;;  %v4748_v34 = vpack.c.bf16 %v4156_v33, %v4154_v32  ;;  %v4153_v35 = vld [vmem:[%s6759_s26 + $0xa0] sm:$0xff]  ;;  %v4170_v37 = vld [vmem:[%s6759_s26 + $0xc8] sm:$0xff]  ;;  %v4172_v38 = vld [vmem:[%s6759_s26 + $0xd8] sm:$0xff] }
  0x26   : > { %4745 = vmatprep.subr.bf16.mxu1 %v4744_v26  ;;  %v5506_v39 = vld [vmem:[%s5464_s18 + $0x8] sm:$0xff]  ;;  %v4750_v40 = vpack.c.bf16 %v4155_v36, %v4153_v35  ;;  %v4760_v41 = vpack.c.bf16 %v4172_v38, %v4170_v37  ;;  %v575_v42 = vld [vmem:[%s5464_s18 + $0x10] sm:$0xff]  ;;  %v576_v43 = vld [vmem:[%s5464_s18 + $0x18] sm:$0xff] }
  0x27   : > { %v4169_v44 = vld [vmem:[%s6759_s26 + $0xc0] sm:$0xff]  ;;  %v4171_v45 = vld [vmem:[%s6759_s26 + $0xd0] sm:$0xff]  ;;  %v4174_v46 = vld [vmem:[%s6759_s26 + $0xe8] sm:$0xff] }
  0x28   : > { %4133 = vmatmul.mubr.msk.f32.vlgmr.msra.gmra.mrb[0].mxu1 %vm585_vm0, %v5482_v30  ;;  %4719 = vmatpush1.bf16.msra.mxu0 %v4718_v27  ;;  %v4176_v47 = vld [vmem:[%s6759_s26 + $0xf8] sm:$0xff]  ;;  %v4762_v48 = vpack.c.bf16 %v4171_v45, %v4169_v44  ;;  %v4173_v50 = vld [vmem:[%s6759_s26 + $0xe0] sm:$0xff]  ;;  %v4175_v51 = vld [vmem:[%s6759_s26 + $0xf0] sm:$0xff] }
  0x29   : > { %770 = vmatprep.mubr.f32.mxu1 %v5264_v7  ;;  %4747 = vmatpush1.bf16.msra.mxu1 %v4746_v31  ;;  %v4764_v49 = vpack.c.bf16 %v4176_v47, %v4174_v46  ;;  %v4190_v52 = vld [vmem:[%s6759_s26 + $0x108] sm:$0xff]  ;;  %v4192_v53 = vld [vmem:[%s6759_s26 + $0x118] sm:$0xff]  ;;  %v4766_v54 = vpack.c.bf16 %v4175_v51, %v4173_v50  ;;  %v4189_v56 = vld [vmem:[%s6759_s26 + $0x100] sm:$0xff] }
  0x2a   : > { %4749 = vmatprep.subr.bf16.mxu1 %v4748_v34  ;;  %v4776_v55 = vpack.c.bf16 %v4192_v53, %v4190_v52  ;;  %v4191_v57 = vld [vmem:[%s6759_s26 + $0x110] sm:$0xff]  ;;  %v4194_v58 = vld [vmem:[%s6759_s26 + $0x128] sm:$0xff]  ;;  %v4196_v59 = vld [vmem:[%s6759_s26 + $0x138] sm:$0xff] }
  0x2b   : > { %4121 = vmatmul.mubr.msk.f32.vlgmr.msra.gmra.mrb[0].mxu0 %vm585_vm0, %v5482_v30  ;;  %v4778_v60 = vpack.c.bf16 %v4191_v57, %v4189_v56  ;;  %v4780_v61 = vpack.c.bf16 %v4196_v59, %v4194_v58  ;;  %v4193_v62 = vld [vmem:[%s6759_s26 + $0x120] sm:$0xff]  ;;  %v4195_v63 = vld [vmem:[%s6759_s26 + $0x130] sm:$0xff]  ;;  %v4140_v38 = vld [vmem:[%s6761_s1 + $0x38] sm:$0xf] }
  0x2c   : > { %4134 = vmatmul.mubr.msk.f32.gmra.mrb[2].mxu1 %vm585_vm0, %v5506_v39  ;;  %668 = vmatprep.mubr.f32.mxu0 %v5264_v7  ;;  %v4782_v0 = vpack.c.bf16 %v4195_v63, %v4193_v62  ;;  %v4137_v26 = vld [vmem:[%s6761_s1 + $0x20] sm:$0xff]  ;;  %v4139_v35 = vld [vmem:[%s6761_s1 + $0x30] sm:$0xff]  ;;  %v688_v46 = vld [vmem:[%s6761_s1 + $0x8] sm:$0xff] }
  0x2d   : > { %776 = vmatprep.mubr.f32.mxu1 %v5264_v7  ;;  %4751 = vmatpush1.bf16.msra.mxu1 %v4750_v40  ;;  %v689_v51 = vld [vmem:[%s6761_s1 + $0x10] sm:$0xff]  ;;  %v4161_v59 = vld [vmem:[%s6761_s1 + $0x40] sm:$0xff]  ;;  %v4162_v62 = vld [vmem:[%s6761_s1 + $0x48] sm:$0xff] }
  0x2e   : > { %4761 = vmatprep.subr.bf16.mxu1 %v4760_v41 }
  0x2f   : > { %4122 = vmatmul.mubr.msk.f32.gmra.mrb[2].mxu0 %vm585_vm0, %v5506_v39 }
  0x30   : > { %4135 = vmatmul.mubr.msk.f32.gmra.mrb[4].mxu1 %vm585_vm0, %v575_v42  ;;  %674 = vmatprep.mubr.f32.mxu0 %v5264_v7 }
  0x31   : > { %782 = vmatprep.mubr.f32.mxu1 %v5264_v7 }
  0x33   : > { %4123 = vmatmul.mubr.msk.f32.gmra.mrb[4].mxu0 %vm585_vm0, %v575_v42 }
  0x34   : > { %4136 = vmatmul.mubr.msk.f32.gmra.mrb[6].mxu1 %vm585_vm0, %v576_v43  ;;  %680 = vmatprep.mubr.f32.mxu0 %v5264_v7 }
  0x35   : > { %1069 = vmatprep.mubr.f32.mxu1 %v5264_v7 }
  0x37   : > { %4124 = vmatmul.mubr.msk.f32.gmra.mrb[6].mxu0 %vm585_vm0, %v576_v43 }
  0x38   : > { %4157 = vmatmul.mubr.msk.f32.vlgmr.msra.gmra.mrb[8].mxu1 %vm585_vm0, %v5482_v30  ;;  %870 = vmatprep.mubr.f32.mxu0 %v5264_v7 }
  0x39   : > { %1075 = vmatprep.mubr.f32.mxu1 %v5264_v7  ;;  %4763 = vmatpush1.bf16.msra.mxu1 %v4762_v48 }
  0x3a   : > { %4765 = vmatprep.subr.bf16.mxu1 %v4764_v49 }
  0x3c   : > { %4158 = vmatmul.mubr.msk.f32.gmra.mrb[10].mxu1 %vm585_vm0, %v5506_v39 }
  0x3d   : > { %1081 = vmatprep.mubr.f32.mxu1 %v5264_v7  ;;  %4767 = vmatpush1.bf16.msra.mxu1 %v4766_v54  ;;  %v690_v54 = vld [vmem:[%s6761_s1 + $0x18] sm:$0xf] }
  0x3e   : > { %4777 = vmatprep.subr.bf16.mxu1 %v4776_v55 }
  0x40   : > { %4159 = vmatmul.mubr.msk.f32.gmra.mrb[12].mxu1 %vm585_vm0, %v575_v42 }
  0x41   : > { %1087 = vmatprep.mubr.f32.mxu1 %v5264_v7 }
  0x44   : > { %4160 = vmatmul.mubr.msk.f32.gmra.mrb[14].mxu1 %vm585_vm0, %v576_v43 }
  0x45   : > { %1281 = vmatprep.mubr.f32.mxu1 %v5264_v7 }
  0x48   : > { %4177 = vmatmul.mubr.msk.f32.vlgmr.msra.gmra.mrb[16].mxu1 %vm585_vm0, %v5482_v30 }
  0x49   : > { %1287 = vmatprep.mubr.f32.mxu1 %v5264_v7  ;;  %4779 = vmatpush1.bf16.msra.mxu1 %v4778_v60 }
  0x4a   : > { %4781 = vmatprep.subr.bf16.mxu1 %v4780_v61 }
  0x4c   : > { %4178 = vmatmul.mubr.msk.f32.gmra.mrb[18].mxu1 %vm585_vm0, %v5506_v39 }
  0x4d   : > { %1293 = vmatprep.mubr.f32.mxu1 %v5264_v7  ;;  %4783 = vmatpush1.bf16.msra.mxu1 %v4782_v0 }
  0x50   : > { %4179 = vmatmul.mubr.msk.f32.gmra.mrb[20].mxu1 %vm585_vm0, %v575_v42 }
  0x51   : > { %1299 = vmatprep.mubr.f32.mxu1 %v5264_v7 }
  0x54   : > { %4180 = vmatmul.mubr.msk.f32.gmra.mrb[22].mxu1 %vm585_vm0, %v576_v43 }
  0x55   : > { %1493 = vmatprep.mubr.f32.mxu1 %v5264_v7 }
  0x58   : > { %4197 = vmatmul.mubr.msk.f32.vlgmr.msra.gmra.mrb[24].mxu1 %vm585_vm0, %v5482_v30  ;;  %v4138_v30 = vld [vmem:[%s6761_s1 + $0x28] sm:$0xff] }
  0x59   : > { %1499 = vmatprep.mubr.f32.mxu1 %v5264_v7 }
  0x5c   : > { %4198 = vmatmul.mubr.msk.f32.gmra.mrb[26].mxu1 %vm585_vm0, %v5506_v39 }
  0x5d   : > { %1505 = vmatprep.mubr.f32.mxu1 %v5264_v7 }
  0x60   : > { %4199 = vmatmul.mubr.msk.f32.gmra.mrb[28].mxu1 %vm585_vm0, %v575_v42 }
  0x61   : > { %1511 = vmatprep.mubr.f32.mxu1 %v5264_v7 }
  0x64   : > { %4200 = vmatmul.mubr.msk.f32.gmra.mrb[30].mxu1 %vm585_vm0, %v576_v43  ;;  %v687_v43 = vld [vmem:[%s6761_s1] sm:$0xff] }
  0x65   : > { %1740 = vmatprep.mubr.f32.mxu1 %v5264_v7 }
  0xfb   : > { %v766_v1 = vpop.f32.mrb[0].mxu1 }
  0xfc   : > { %v768_v2 = vpop.f32.mrb[1].mxu1 }
  0xfe   : > { %v664_v3 = vpop.f32.mrb[0].mxu0 }
  0xff   : > { %v772_v4 = vpop.f32.mrb[2].mxu1  ;;  %v666_v5 = vpop.f32.mrb[1].mxu0 }
 0x100   : > { %v4730_v6 = vpack.c.bf16 %v772_v4, %v766_v1  ;;  %v774_v8 = vpop.f32.mrb[3].mxu1 }
 0x101   : > { %v4728_v9 = vpack.c.bf16 %v774_v8, %v768_v2 }
 0x102   : > { %v670_v10 = vpop.f32.mrb[2].mxu0 }
 0x103   : > { %v778_v11 = vpop.f32.mrb[4].mxu1  ;;  %4729 = vmatprep.subr.bf16.mxu0 %v4728_v9  ;;  %v4738_v12 = vpack.c.bf16 %v670_v10, %v664_v3  ;;  %v672_v13 = vpop.f32.mrb[3].mxu0  ;;  %v4163_v3 = vld [vmem:[%s6761_s1 + $0x50] sm:$0xff] }
 0x104   : > { %v780_v14 = vpop.f32.mrb[5].mxu1  ;;  %4731 = vmatpush1.bf16.msra.mxu0 %v4730_v6  ;;  %v4736_v15 = vpack.c.bf16 %v672_v13, %v666_v5  ;;  %v4164_v6 = vld [vmem:[%s6761_s1 + $0x58] sm:$0xf]  ;;  %v4183_v13 = vld [vmem:[%s6761_s1 + $0x70] sm:$0xff] }
 0x106   : > { %v676_v16 = vpop.f32.mrb[4].mxu0 }
 0x107   : > { %v784_v17 = vpop.f32.mrb[6].mxu1  ;;  %v678_v18 = vpop.f32.mrb[5].mxu0 }
 0x108   : > { %v4734_v19 = vpack.c.bf16 %v784_v17, %v778_v11  ;;  %v786_v20 = vpop.f32.mrb[7].mxu1  ;;  %v4181_v11 = vld [vmem:[%s6761_s1 + $0x60] sm:$0xff]  ;;  %v4203_v17 = vld [vmem:[%s6761_s1 + $0x90] sm:$0xff] }
 0x109   : > { %v4732_v21 = vpack.c.bf16 %v786_v20, %v780_v14  ;;  %v4184_v14 = vld [vmem:[%s6761_s1 + $0x78] sm:$0xf] }
 0x10a   : > { %v682_v22 = vpop.f32.mrb[6].mxu0 }
 0x10b   : > { %4733 = vmatprep.subr.bf16.mxu0 %v4732_v21  ;;  %v4742_v23 = vpack.c.bf16 %v682_v22, %v676_v16  ;;  %v684_v24 = vpop.f32.mrb[7].mxu0  ;;  %v1071_v25 = vpop.f32.mrb[8].mxu1  ;;  %v4202_v16 = vld [vmem:[%s6761_s1 + $0x88] sm:$0xff]  ;;  %v1632_v22 = vld [vmem:[%s6721_s3] sm:$0x3] }
 0x10c   : > { %4735 = vmatpush1.bf16.msra.mxu0 %v4734_v19  ;;  %v4740_v27 = vpack.c.bf16 %v684_v24, %v678_v18  ;;  %v1073_v28 = vpop.f32.mrb[9].mxu1  ;;  %v4204_v18 = vld [vmem:[%s6761_s1 + $0x98] sm:$0xf]  ;;  %v1634_v19 = vlaneseq }
 0x10d   : > { %4737 = vmatprep.subr.bf16.mxu0 %v4736_v15  ;;  %v4201_v15 = vld [vmem:[%s6761_s1 + $0x80] sm:$0xff] }
 0x10e   : > { %v5699_v20 = vshrl.u32 %v1634_v19, 7  ;;  %v1770_v19 = vld [vmem:[%s6723_s5 + $0x88] sm:$0xff] }
 0x10f   : > { %4141 = vmatmul.mubr.msk.f32.vlgmr.msra.gmra.mrb[8].mxu0 %vm585_vm0, %v4137_v26  ;;  %v1077_v29 = vpop.f32.mrb[10].mxu1 }
 0x110   : > { %4739 = vmatpush1.bf16.msra.mxu0 %v4738_v12  ;;  %876 = vmatprep.mubr.f32.mxu0 %v5264_v7  ;;  %v4754_v31 = vpack.c.bf16 %v1077_v29, %v1071_v25  ;;  %v1079_v32 = vpop.f32.mrb[11].mxu1  ;;  %v4182_v12 = vld [vmem:[%s6761_s1 + $0x68] sm:$0xff]  ;;  %v1636_v21 = vsub.s32 0, %v5699_v20 }
 0x111   : > { %4741 = vmatprep.subr.bf16.mxu0 %v4740_v27  ;;  %v4752_v33 = vpack.c.bf16 %v1079_v32, %v1073_v28 }
 0x112   : > { %v1637_v24 = vrot.slane %v1632_v22, %v1636_v21 }
 0x113   : > { %4142 = vmatmul.mubr.msk.f32.gmra.mrb[10].mxu0 %vm585_vm0, %v4138_v30  ;;  %v1083_v34 = vpop.f32.mrb[12].mxu1 }
 0x114   : > { %882 = vmatprep.mubr.f32.mxu0 %v5264_v7  ;;  %4743 = vmatpush1.bf16.msra.mxu0 %v4742_v23  ;;  %v1085_v36 = vpop.f32.mrb[13].mxu1  ;;  %v1640_v23 = vsub.s32 1, %v5699_v20  ;;  %v2885_v20 = vld [vmem:[%s6727_s9] sm:$0x1f] }
 0x115   : > { %4753 = vmatprep.subr.bf16.mxu0 %v4752_v33 }
 0x116   : > { %v1641_v26 = vrot.slane %v1632_v22, %v1640_v23 }
 0x117   : > { %4143 = vmatmul.mubr.msk.f32.gmra.mrb[12].mxu0 %vm585_vm0, %v4139_v35  ;;  %v1089_v37 = vpop.f32.mrb[14].mxu1 }
 0x118   : > { %888 = vmatprep.mubr.f32.mxu0 %v5264_v7  ;;  %v4758_v39 = vpack.c.bf16 %v1089_v37, %v1083_v34  ;;  %v1091_v40 = vpop.f32.mrb[15].mxu1 }
 0x119   : > { %v4756_v41 = vpack.c.bf16 %v1091_v40, %v1085_v36 }
 0x11b   : > { %4144 = vmatmul.mubr.msk.f32.gmra.mrb[14].mxu0 %vm585_vm0, %v4140_v38  ;;  %v1283_v42 = vpop.f32.mrb[16].mxu1 }
 0x11c   : > { %971 = vmatprep.mubr.f32.mxu0 %v5264_v7  ;;  %v1285_v44 = vpop.f32.mrb[17].mxu1 }
 0x11f   : > { %4145 = vmatmul.mubr.msk.f32.vlgmr.msra.gmra.mrb[8].mxu0 %vm585_vm0, %v687_v43  ;;  %v1289_v45 = vpop.f32.mrb[18].mxu1 }
 0x120   : > { %4755 = vmatpush1.bf16.msra.mxu0 %v4754_v31  ;;  %977 = vmatprep.mubr.f32.mxu0 %v5264_v7  ;;  %v4770_v47 = vpack.c.bf16 %v1289_v45, %v1283_v42  ;;  %v1291_v48 = vpop.f32.mrb[19].mxu1 }
 0x121   : > { %4757 = vmatprep.subr.bf16.mxu0 %v4756_v41  ;;  %v4768_v49 = vpack.c.bf16 %v1291_v48, %v1285_v44 }
 0x123   : > { %4146 = vmatmul.mubr.msk.f32.gmra.mrb[10].mxu0 %vm585_vm0, %v688_v46  ;;  %v1295_v50 = vpop.f32.mrb[20].mxu1 }
 0x124   : > { %983 = vmatprep.mubr.f32.mxu0 %v5264_v7  ;;  %4759 = vmatpush1.bf16.msra.mxu0 %v4758_v39  ;;  %v1297_v52 = vpop.f32.mrb[21].mxu1 }
 0x125   : > { %4769 = vmatprep.subr.bf16.mxu0 %v4768_v49 }
 0x127   : > { %4147 = vmatmul.mubr.msk.f32.gmra.mrb[12].mxu0 %vm585_vm0, %v689_v51  ;;  %v1301_v53 = vpop.f32.mrb[22].mxu1 }
 0x128   : > { %989 = vmatprep.mubr.f32.mxu0 %v5264_v7  ;;  %v4774_v55 = vpack.c.bf16 %v1301_v53, %v1295_v50  ;;  %v1303_v56 = vpop.f32.mrb[23].mxu1 }
 0x129   : > { %v4772_v57 = vpack.c.bf16 %v1303_v56, %v1297_v52  ;;  %v1660_v56 = vld [vmem:[%s6722_s4] sm:$0xff] }
 0x12b   : > { %4148 = vmatmul.mubr.msk.f32.gmra.mrb[14].mxu0 %vm585_vm0, %v690_v54  ;;  %v1495_v58 = vpop.f32.mrb[24].mxu1  ;;  %v1753_v54 = vld [vmem:[%s6723_s5] sm:$0xff] }
 0x12c   : > { %1175 = vmatprep.mubr.f32.mxu0 %v5264_v7  ;;  %v1497_v60 = vpop.f32.mrb[25].mxu1 }
 0x12f   : > { %4165 = vmatmul.mubr.msk.f32.vlgmr.msra.gmra.mrb[8].mxu0 %vm585_vm0, %v4161_v59  ;;  %v1501_v61 = vpop.f32.mrb[26].mxu1  ;;  %v1755_v59 = vld [vmem:[%s6723_s5 + $0x10] sm:$0xff] }
 0x130   : > { %4771 = vmatpush1.bf16.msra.mxu0 %v4770_v47  ;;  %1181 = vmatprep.mubr.f32.mxu0 %v5264_v7  ;;  %v4786_v63 = vpack.c.bf16 %v1501_v61, %v1495_v58  ;;  %v1503_v0 = vpop.f32.mrb[27].mxu1  ;;  %v5266_v58 = vmov 0.0|0.0   ;;  %v1661_v61 = vld [vmem:[%s6722_s4 + $0x8] sm:$0x3f] }
 0x131   : > { %4773 = vmatprep.subr.bf16.mxu0 %v4772_v57  ;;  %v4784_v1 = vpack.c.bf16 %v1503_v0, %v1497_v60  ;;  %v1756_v60 = vld [vmem:[%s6723_s5 + $0x18] sm:$0xff]  ;;  %v1758_v0 = vld [vmem:[%s6723_s5 + $0x28] sm:$0xff] }
 0x133   : > { %4166 = vmatmul.mubr.msk.f32.gmra.mrb[10].mxu0 %vm585_vm0, %v4162_v62  ;;  %v1507_v2 = vpop.f32.mrb[28].mxu1  ;;  %v4806_v62 = vpack.c.bf16 %v1756_v60, %v1755_v59  ;;  %v1877_v59 = vld [vmem:[%s6725_s7 + $0xa8] sm:$0xf]  ;;  %v1876_v60 = vld [vmem:[%s6725_s7 + $0xa0] sm:$0xf] }
 0x134   : > { %1187 = vmatprep.mubr.f32.mxu0 %v5264_v7  ;;  %4775 = vmatpush1.bf16.msra.mxu0 %v4774_v55  ;;  %v1509_v4 = vpop.f32.mrb[29].mxu1  ;;  %v1754_v55 = vld [vmem:[%s6723_s5 + $0x8] sm:$0xff] }
 0x135   : > { %4785 = vmatprep.subr.bf16.mxu0 %v4784_v1  ;;  %v4803_v57 = vpack.c.bf16 %v1754_v55, %v1753_v54  ;;  %v1872_v55 = vld [vmem:[%s6725_s7 + $0x80] sm:$0xff] }
 0x137   : > { %4167 = vmatmul.mubr.msk.f32.gmra.mrb[12].mxu0 %vm585_vm0, %v4163_v3  ;;  %v1513_v5 = vpop.f32.mrb[30].mxu1  ;;  %v1760_v3 = vld [vmem:[%s6723_s5 + $0x38] sm:$0xff] }
 0x138   : > { %1193 = vmatprep.mubr.f32.mxu0 %v5264_v7  ;;  %v4790_v8 = vpack.c.bf16 %v1513_v5, %v1507_v2  ;;  %v1515_v9 = vpop.f32.mrb[31].mxu1  ;;  %v1759_v2 = vld [vmem:[%s6723_s5 + $0x30] sm:$0xff]  ;;  %v1761_v5 = vld [vmem:[%s6723_s5 + $0x40] sm:$0xff] }
 0x139   : > { %v4788_v10 = vpack.c.bf16 %v1515_v9, %v1509_v4  ;;  %v4812_v4 = vpack.c.bf16 %v1760_v3, %v1759_v2  ;;  %v1763_v9 = vld [vmem:[%s6723_s5 + $0x50] sm:$0xff]  ;;  %v4222_v2 = vld [vmem:[%s6725_s7 + $0xc8] sm:$0xff] }
 0x13b   : > { %4168 = vmatmul.mubr.msk.f32.gmra.mrb[14].mxu0 %vm585_vm0, %v4164_v6  ;;  %v1762_v6 = vld [vmem:[%s6723_s5 + $0x48] sm:$0xff] }
 0x13c   : > { %1387 = vmatprep.mubr.f32.mxu0 %v5264_v7 }
 0x13f   : > { %4185 = vmatmul.mubr.msk.f32.vlgmr.msra.gmra.mrb[8].mxu0 %vm585_vm0, %v4181_v11 }
 0x140   : > { %4787 = vmatpush1.bf16.msra.mxu0 %v4786_v63  ;;  %1393 = vmatprep.mubr.f32.mxu0 %v5264_v7  ;;  %v1757_v63 = vld [vmem:[%s6723_s5 + $0x20] sm:$0xff] }
 0x141   : > { %4789 = vmatprep.subr.bf16.mxu0 %v4788_v10  ;;  %v4809_v1 = vpack.c.bf16 %v1758_v0, %v1757_v63  ;;  %v1764_v10 = vld [vmem:[%s6723_s5 + $0x58] sm:$0xff] }
 0x142   : > { %v4818_v11 = vpack.c.bf16 %v1764_v10, %v1763_v9 }
 0x143   : > { %4186 = vmatmul.mubr.msk.f32.gmra.mrb[10].mxu0 %vm585_vm0, %v4182_v12  ;;  %v1765_v12 = vld [vmem:[%s6723_s5 + $0x60] sm:$0xff] }
 0x144   : > { %1399 = vmatprep.mubr.f32.mxu0 %v5264_v7  ;;  %4791 = vmatpush1.bf16.msra.mxu0 %v4790_v8  ;;  %v4815_v8 = vpack.c.bf16 %v1762_v6, %v1761_v5  ;;  %v4221_v5 = vld [vmem:[%s6725_s7 + $0xc0] sm:$0xff]  ;;  %v4224_v6 = vld [vmem:[%s6725_s7 + $0xd8] sm:$0xff] }
 0x147   : > { %4187 = vmatmul.mubr.msk.f32.gmra.mrb[12].mxu0 %vm585_vm0, %v4183_v13  ;;  %v1766_v13 = vld [vmem:[%s6723_s5 + $0x68] sm:$0xff] }
 0x148   : > { %1405 = vmatprep.mubr.f32.mxu0 %v5264_v7 }
 0x14b   : > { %4188 = vmatmul.mubr.msk.f32.gmra.mrb[14].mxu0 %vm585_vm0, %v4184_v14  ;;  %v4821_v14 = vpack.c.bf16 %v1766_v13, %v1765_v12  ;;  %v4225_v12 = vld [vmem:[%s6725_s7 + $0xe0] sm:$0xff] }
 0x14c   : > { %1599 = vmatprep.mubr.f32.mxu0 %v5264_v7 }
 0x14f   : > { %4205 = vmatmul.mubr.msk.f32.vlgmr.msra.gmra.mrb[8].mxu0 %vm585_vm0, %v4201_v15  ;;  %v1767_v15 = vld [vmem:[%s6723_s5 + $0x70] sm:$0xff] }
 0x150   : > { %1605 = vmatprep.mubr.f32.mxu0 %v5264_v7 }
 0x153   : > { %4206 = vmatmul.mubr.msk.f32.gmra.mrb[10].mxu0 %vm585_vm0, %v4202_v16  ;;  %v1768_v16 = vld [vmem:[%s6723_s5 + $0x78] sm:$0xff] }
 0x154   : > { %1611 = vmatprep.mubr.f32.mxu0 %v5264_v7 }
 0x157   : > { %4207 = vmatmul.mubr.msk.f32.gmra.mrb[12].mxu0 %vm585_vm0, %v4203_v17  ;;  %v4824_v17 = vpack.c.bf16 %v1768_v16, %v1767_v15  ;;  %v4230_v15 = vld [vmem:[%s6725_s7 + $0x108] sm:$0xff] }
 0x158   : > { %1617 = vmatprep.mubr.f32.mxu0 %v5264_v7 }
 0x15b   : > { %4208 = vmatmul.mubr.msk.f32.gmra.mrb[14].mxu0 %vm585_vm0, %v4204_v18  ;;  %v1769_v18 = vld [vmem:[%s6723_s5 + $0x80] sm:$0xff] }
 0x15c   : > { %1955 = vmatprep.mubr.f32.mxu0 %v5264_v7  ;;  %v4827_v22 = vpack.c.bf16 %v1770_v19, %v1769_v18  ;;  %v4227_v19 = vld [vmem:[%s6725_s7 + $0xf0] sm:$0xff] }
 0x222   : > { %v1601_v25 = vpop.f32.mrb[8].mxu0 }
 0x223   : > { %v1603_v27 = vpop.f32.mrb[9].mxu0  ;;  %v1644_v28 = vadd.f32 %v1637_v24, %v1601_v25  ;;  %v1772_v25 = vld [vmem:[%s6723_s5 + $0x98] sm:$0xff] }
 0x224   : > { %v1645_v29 = vadd.f32 %v1641_v26, %v1603_v27  ;;  %v1773_v27 = vld [vmem:[%s6723_s5 + $0xa0] sm:$0xff] }
 0x225   : > { %v1652_v34 = vmax.f32 %v1644_v28, 0.0  ;;  %v1857_v28 = vld [vmem:[%s6725_s7 + $0x8] sm:$0xff] }
 0x226   : > { %v1607_v30 = vpop.f32.mrb[10].mxu0  ;;  %v1653_v36 = vmax.f32 %v1645_v29, 0.0  ;;  %v1859_v29 = vld [vmem:[%s6725_s7 + $0x18] sm:$0xff] }
 0x227   : > { %v1646_v31 = vadd.f32 %v1637_v24, %v1607_v30  ;;  %v1609_v32 = vpop.f32.mrb[11].mxu0  ;;  %v1856_v30 = vld [vmem:[%s6725_s7] sm:$0xff] }
 0x228   : > { %v1647_v33 = vadd.f32 %v1641_v26, %v1609_v32  ;;  %v1858_v32 = vld [vmem:[%s6725_s7 + $0x10] sm:$0xff] }
 0x229   : > { %v1654_v35 = vmax.f32 %v1646_v31, 0.0  ;;  %v4832_v31 = vpack.c.bf16 %v1859_v29, %v1857_v28 }
 0x22a   : > { %v1655_v37 = vmax.f32 %v1647_v33, 0.0  ;;  %v1613_v38 = vpop.f32.mrb[12].mxu0  ;;  %v1861_v33 = vld [vmem:[%s6725_s7 + $0x28] sm:$0xff] }
 0x22b   : > { %v4794_v39 = vpack.c.bf16 %v1654_v35, %v1652_v34  ;;  %v1615_v40 = vpop.f32.mrb[13].mxu0  ;;  %v1648_v42 = vadd.f32 %v1637_v24, %v1613_v38  ;;  %v1863_v34 = vld [vmem:[%s6725_s7 + $0x38] sm:$0xff]  ;;  %v4834_v35 = vpack.c.bf16 %v1858_v32, %v1856_v30  ;;  %v1862_v38 = vld [vmem:[%s6725_s7 + $0x30] sm:$0xff]  ;;  %4833 = vmatprep.subr.bf16.mxu0 %v4832_v31  ;;  %v4233_v31 = vld [vmem:[%s6725_s7 + $0x120] sm:$0xff] }
 0x22c   : > { %v4792_v41 = vpack.c.bf16 %v1655_v37, %v1653_v36  ;;  %v1649_v43 = vadd.f32 %v1641_v26, %v1615_v40  ;;  %v4836_v36 = vpack.c.bf16 %v1863_v34, %v1861_v33  ;;  %v1860_v37 = vld [vmem:[%s6725_s7 + $0x20] sm:$0xff]  ;;  %v1867_v40 = vld [vmem:[%s6725_s7 + $0x58] sm:$0xff]  ;;  %v4231_v30 = vld [vmem:[%s6725_s7 + $0x110] sm:$0xff] }
 0x22d   : > { %v1656_v48 = vmax.f32 %v1648_v42, 0.0  ;;  %4835 = vmatpush1.bf16.msra.mxu0 %v4834_v35  ;;  %v4236_v32 = vld [vmem:[%s6725_s7 + $0x138] sm:$0xff]  ;;  %v4238_v33 = vld [vmem:[%s6725_s7 + $0x148] sm:$0xff]  ;;  %v4866_v34 = vpack.c.bf16 %v4233_v31, %v4231_v30  ;;  %v4327_v31 = vld [vmem:[%s6725_s7 + $0x300] sm:$0xff] }
 0x22e   : > { %v1619_v44 = vpop.f32.mrb[14].mxu0  ;;  %4793 = vmatprep.subr.bf16.mxu1 %v4792_v41  ;;  %v1657_v50 = vmax.f32 %v1649_v43, 0.0  ;;  %v4838_v41 = vpack.c.bf16 %v1862_v38, %v1860_v37  ;;  %4837 = vmatprep.subr.bf16.mxu0 %v4836_v36  ;;  %v1864_v43 = vld [vmem:[%s6725_s7 + $0x40] sm:$0xff]  ;;  %v4868_v35 = vpack.c.bf16 %v4238_v33, %v4236_v32  ;;  %v4235_v36 = vld [vmem:[%s6725_s7 + $0x130] sm:$0xff]  ;;  %v4332_v33 = vld [vmem:[%s6725_s7 + $0x328] sm:$0xff] }
 0x22f   : > { %v1650_v45 = vadd.f32 %v1637_v24, %v1619_v44  ;;  %v1621_v46 = vpop.f32.mrb[15].mxu0  ;;  %4795 = vmatpush1.bf16.msra.mxu1 %v4794_v39  ;;  %v1771_v24 = vld [vmem:[%s6723_s5 + $0x90] sm:$0xff]  ;;  %v1865_v39 = vld [vmem:[%s6725_s7 + $0x48] sm:$0xff]  ;;  %v4237_v37 = vld [vmem:[%s6725_s7 + $0x140] sm:$0xff] }
 0x230   : > { %v1651_v47 = vadd.f32 %v1641_v26, %v1621_v46  ;;  %v4830_v26 = vpack.c.bf16 %v1772_v25, %v1771_v24  ;;  %v4840_v42 = vpack.c.bf16 %v1867_v40, %v1865_v39  ;;  %v1866_v44 = vld [vmem:[%s6725_s7 + $0x50] sm:$0xff]  ;;  %v1871_v46 = vld [vmem:[%s6725_s7 + $0x78] sm:$0xff]  ;;  %v4870_v38 = vpack.c.bf16 %v4237_v37, %v4235_v36  ;;  %v4331_v37 = vld [vmem:[%s6725_s7 + $0x320] sm:$0xff] }
 0x231   : > { %v1658_v49 = vmax.f32 %v1650_v45, 0.0  ;;  %v1869_v45 = vld [vmem:[%s6725_s7 + $0x68] sm:$0xff]  ;;  %4839 = vmatpush1.bf16.msra.mxu0 %v4838_v41  ;;  %v4232_v25 = vld [vmem:[%s6725_s7 + $0x118] sm:$0xff]  ;;  %v4329_v32 = vld [vmem:[%s6725_s7 + $0x310] sm:$0xff] }
 0x232   : > { %v1659_v51 = vmax.f32 %v1651_v47, 0.0  ;;  %v4842_v47 = vpack.c.bf16 %v1866_v44, %v1864_v43  ;;  %4841 = vmatprep.subr.bf16.mxu0 %v4840_v42  ;;  %v4240_v39 = vld [vmem:[%s6725_s7 + $0x158] sm:$0xf]  ;;  %v4290_v41 = vld [vmem:[%s6725_s7 + $0x228] sm:$0xff]  ;;  %v4287_v42 = vld [vmem:[%s6725_s7 + $0x210] sm:$0xff] }
 0x233   : > { %v4799_v52 = vpack.c.bf16 %v1658_v49, %v1656_v48  ;;  %v4844_v48 = vpack.c.bf16 %v1871_v46, %v1869_v45  ;;  %v1868_v49 = vld [vmem:[%s6725_s7 + $0x60] sm:$0xff]  ;;  %v4288_v40 = vld [vmem:[%s6725_s7 + $0x218] sm:$0xff]  ;;  %v4294_v45 = vld [vmem:[%s6725_s7 + $0x248] sm:$0xff] }
 0x234   : > { %v4796_v53 = vpack.c.bf16 %v1659_v51, %v1657_v50  ;;  %v1870_v50 = vld [vmem:[%s6725_s7 + $0x70] sm:$0xff]  ;;  %v1873_v51 = vld [vmem:[%s6725_s7 + $0x88] sm:$0xff]  ;;  %v4289_v43 = vld [vmem:[%s6725_s7 + $0x220] sm:$0xff] }
 0x235   : > { %4843 = vmatpush1.bf16.msra.mxu0 %v4842_v47  ;;  %v4292_v44 = vld [vmem:[%s6725_s7 + $0x238] sm:$0xff]  ;;  %v4239_v46 = vld [vmem:[%s6725_s7 + $0x150] sm:$0xf]  ;;  %v4910_v47 = vpack.c.bf16 %v4290_v41, %v4288_v40 }
 0x236   : > { %4798 = vmatprep.subr.msk.bf16.mxu1 %vm4797_vm3, %v4796_v53  ;;  %v4846_v53 = vpack.c.bf16 %v1870_v50, %v1868_v49  ;;  %4845 = vmatprep.subr.bf16.mxu0 %v4844_v48  ;;  %v4912_v48 = vpack.c.bf16 %v4289_v43, %v4287_v42  ;;  %v4914_v49 = vpack.c.bf16 %v4294_v45, %v4292_v44  ;;  %v4291_v50 = vld [vmem:[%s6725_s7 + $0x230] sm:$0xff]  ;;  %v4338_v40 = vld [vmem:[%s6725_s7 + $0x358] sm:$0xff]  ;;  %v4335_v43 = vld [vmem:[%s6725_s7 + $0x340] sm:$0xff] }
 0x237   : > { %4801 = vmatpush1.bf16.msk.msra.mxu1 %vm4797_vm3, %v4799_v52  ;;  %v1875_v52 = vld [vmem:[%s6725_s7 + $0x98] sm:$0xff]  ;;  %v4337_v44 = vld [vmem:[%s6725_s7 + $0x350] sm:$0xff] }
 0x238   : > { %4802 = vmatprep.subr.bf16.mxu1 %v5266_v58  ;;  %v4848_v54 = vpack.c.bf16 %v1875_v52, %v1873_v51  ;;  %v4293_v51 = vld [vmem:[%s6725_s7 + $0x240] sm:$0xff]  ;;  %v4296_v52 = vld [vmem:[%s6725_s7 + $0x258] sm:$0xff]  ;;  %v4954_v45 = vpack.c.bf16 %v4337_v44, %v4335_v43  ;;  %v4276_v44 = vld [vmem:[%s6725_s7 + $0x208] sm:$0xf] }
 0x239   : > { %4847 = vmatpush1.bf16.msra.mxu0 %v4846_v53  ;;  %v4298_v53 = vld [vmem:[%s6725_s7 + $0x268] sm:$0xff] }
 0x23a   : > { %4211 = vmatmul.mubr.msk.f32.vlgmr.msra.gmra.mrb[32].mxu1 %vm1662_vm4, %v1660_v56  ;;  %v1874_v56 = vld [vmem:[%s6725_s7 + $0x90] sm:$0xff]  ;;  %4849 = vmatprep.subr.bf16.mxu0 %v4848_v54  ;;  %v4916_v54 = vpack.c.bf16 %v4293_v51, %v4291_v50 }
 0x23b   : > { %1746 = vmatprep.mubr.f32.mxu1 %v5264_v7  ;;  %4804 = vmatpush1.bf16.msra.mxu1 %v4803_v57  ;;  %v4850_v57 = vpack.c.bf16 %v1874_v56, %v1872_v55  ;;  %v4918_v55 = vpack.c.bf16 %v4298_v53, %v4296_v52  ;;  %v4295_v56 = vld [vmem:[%s6725_s7 + $0x250] sm:$0xff] }
 0x23c   : > { %4805 = vmatprep.subr.bf16.mxu1 %v5266_v58 }
 0x23d   : > { %4851 = vmatpush1.bf16.msra.mxu0 %v4850_v57  ;;  %v4297_v57 = vld [vmem:[%s6725_s7 + $0x260] sm:$0xff] }
 0x23e   : > { %4212 = vmatmul.mubr.msk.f32.gmra.mrb[34].mxu1 %vm1662_vm4, %v1661_v61  ;;  %4215 = vmatprep.subr.msk.mxu0 %vm1669_vm1, %v1877_v59  ;;  %v4300_v59 = vld [vmem:[%s6725_s7 + $0x278] sm:$0xff] }
 0x23f   : > { %4807 = vmatpush1.bf16.msra.mxu1 %v4806_v62 }
 0x240   : > { %4808 = vmatprep.subr.bf16.mxu1 %v5266_v58 }
 0x241   : > { %4216 = vmatpush1.msk.msra.mxu0 %vm1669_vm1, %v1876_v60  ;;  %v4302_v60 = vld [vmem:[%s6725_s7 + $0x288] sm:$0xff] }
 0x243   : > { %4810 = vmatpush1.bf16.msra.mxu1 %v4809_v1  ;;  %v4220_v1 = vld [vmem:[%s6725_s7 + $0xb8] sm:$0xff] }
 0x244   : > { %4811 = vmatprep.subr.bf16.mxu1 %v5266_v58  ;;  %v4852_v3 = vpack.c.bf16 %v4222_v2, %v4220_v1  ;;  %v4304_v1 = vld [vmem:[%s6725_s7 + $0x298] sm:$0xff]  ;;  %v4306_v2 = vld [vmem:[%s6725_s7 + $0x2a8] sm:$0xff] }
 0x246   : > { %4853 = vmatprep.subr.bf16.mxu0 %v4852_v3 }
 0x247   : > { %4813 = vmatpush1.bf16.msra.mxu1 %v4812_v4  ;;  %v4219_v4 = vld [vmem:[%s6725_s7 + $0xb0] sm:$0xff] }
 0x248   : > { %4814 = vmatprep.subr.bf16.mxu1 %v5266_v58  ;;  %v4854_v9 = vpack.c.bf16 %v4221_v5, %v4219_v4  ;;  %v4926_v4 = vpack.c.bf16 %v4306_v2, %v4304_v1  ;;  %v4303_v5 = vld [vmem:[%s6725_s7 + $0x290] sm:$0xff]  ;;  %v4246_v2 = vld [vmem:[%s6724_s6 + $0x18] sm:$0x3] }
 0x24b   : > { %4816 = vmatpush1.bf16.msra.mxu1 %v4815_v8  ;;  %v4226_v8 = vld [vmem:[%s6725_s7 + $0xe8] sm:$0xff] }
 0x24c   : > { %4817 = vmatprep.subr.bf16.mxu1 %v5266_v58  ;;  %v4856_v10 = vpack.c.bf16 %v4226_v8, %v4224_v6  ;;  %v4305_v6 = vld [vmem:[%s6725_s7 + $0x2a0] sm:$0xff] }
 0x24d   : > { %v4928_v8 = vpack.c.bf16 %v4305_v6, %v4303_v5  ;;  %v4260_v5 = vld [vmem:[%s6725_s7 + $0x188] sm:$0xff]  ;;  %v4262_v6 = vld [vmem:[%s6725_s7 + $0x198] sm:$0xff] }
 0x24f   : > { %4819 = vmatpush1.bf16.msra.mxu1 %v4818_v11  ;;  %v4223_v11 = vld [vmem:[%s6725_s7 + $0xd0] sm:$0xff] }
 0x250   : > { %4820 = vmatprep.subr.bf16.mxu1 %v5266_v58 }
 0x253   : > { %4822 = vmatpush1.bf16.msra.mxu1 %v4821_v14  ;;  %v4228_v14 = vld [vmem:[%s6725_s7 + $0xf8] sm:$0xff] }
 0x254   : > { %4823 = vmatprep.subr.bf16.mxu1 %v5266_v58  ;;  %v4860_v18 = vpack.c.bf16 %v4230_v15, %v4228_v14  ;;  %v4321_v14 = vld [vmem:[%s6725_s7 + $0x2d0] sm:$0xff]  ;;  %v4324_v15 = vld [vmem:[%s6725_s7 + $0x2e8] sm:$0xff] }
 0x257   : > { %4825 = vmatpush1.bf16.msra.mxu1 %v4824_v17  ;;  %v4858_v17 = vpack.c.bf16 %v4225_v12, %v4223_v11  ;;  %v4322_v11 = vld [vmem:[%s6725_s7 + $0x2d8] sm:$0xff]  ;;  %v4319_v12 = vld [vmem:[%s6725_s7 + $0x2c0] sm:$0xff] }
 0x258   : > { %4826 = vmatprep.subr.bf16.mxu1 %v5266_v58 }
 0x25b   : > { %4828 = vmatpush1.bf16.msra.mxu1 %v4827_v22  ;;  %v4229_v22 = vld [vmem:[%s6725_s7 + $0x100] sm:$0xff] }
 0x25c   : > { %4829 = vmatprep.subr.bf16.mxu1 %v5266_v58  ;;  %v4862_v28 = vpack.c.bf16 %v4229_v22, %v4227_v19  ;;  %v4938_v19 = vpack.c.bf16 %v4321_v14, %v4319_v12  ;;  %v4261_v12 = vld [vmem:[%s6725_s7 + $0x190] sm:$0xff]  ;;  %v4264_v14 = vld [vmem:[%s6725_s7 + $0x1a8] sm:$0xff] }
 0x25f   : > { %4831 = vmatpush1.bf16.msra.mxu1 %v4830_v26  ;;  %v4234_v26 = vld [vmem:[%s6725_s7 + $0x128] sm:$0xff] }
 0x260   : > { %1821 = vmatprep.subr.mxu1 %v5264_v7  ;;  %v4864_v29 = vpack.c.bf16 %v4234_v26, %v4232_v25  ;;  %v4323_v25 = vld [vmem:[%s6725_s7 + $0x2e0] sm:$0xff]  ;;  %v4325_v26 = vld [vmem:[%s6725_s7 + $0x2f0] sm:$0xff] }
 0x263   : > { %1822 = vmatpush1.msra.mxu1 %v1773_v27 }
 0x30d   : > { %v1742_v61 = vpop.f32.mrb[32].mxu1 }
 0x30e   : > { %v1744_v62 = vpop.f32.mrb[33].mxu1 }
 0x30f   : > { %4213 = vmatprep.mubr.msk.f32.mxu1 %vm1774_vm5, %v1744_v62  ;;  %v4922_v62 = vpack.c.bf16 %v4302_v60, %v4300_v59 }
 0x310   : > { %1846 = vmatmul.mubr.f32.vlgmr.msra.gmra.mrb[36].mxu1 %v1742_v61  ;;  %v4920_v61 = vpack.c.bf16 %v4297_v57, %v4295_v56  ;;  %v4346_v57 = vld [vmem:[%s6724_s6 + $0x48] sm:$0x3] }
 0x311   : > { %v1748_v63 = vpop.f32.mrb[34].mxu1 }
 0x312   : > { %v1750_v0 = vpop.f32.mrb[35].mxu1 }
 0x313   : > { %4214 = vmatprep.mubr.msk.f32.mxu1 %vm1774_vm5, %v1750_v0  ;;  %v4301_v0 = vld [vmem:[%s6725_s7 + $0x280] sm:$0xff] }
 0x314   : > { %1851 = vmatmul.mubr.f32.gmra.mrb[38].mxu1 %v1748_v63  ;;  %v4299_v63 = vld [vmem:[%s6725_s7 + $0x270] sm:$0xff] }
 0x315   : > { %2157 = vmatprep.mubr.f32.mxu1 %v5264_v7  ;;  %v4924_v3 = vpack.c.bf16 %v4301_v0, %v4299_v63  ;;  %v4258_v63 = vld [vmem:[%s6725_s7 + $0x178] sm:$0xff]  ;;  %v4245_v0 = vld [vmem:[%s6724_s6 + $0x10] sm:$0xff] }
 0x3e3   : > { %v5886_v13 = vpop.f32.mrb[36].mxu1 }
 0x3e4   : > { %v1849_v16 = vpop.f32.mrb[37].mxu1  ;;  %4217 = vmatmul.mubr.msk.f32.vlgmr.msra.gmra.mrb[16].mxu0 %vm1878_vm6, %v5886_v13 }
 0x3e5   : > { %4855 = vmatpush1.bf16.msra.mxu0 %v4854_v9  ;;  %1961 = vmatprep.mubr.f32.mxu0 %v5264_v7  ;;  %v4308_v9 = vld [vmem:[%s6725_s7 + $0x2b8] sm:$0xf] }
 0x3e6   : > { %4857 = vmatprep.subr.bf16.mxu0 %v4856_v10  ;;  %v4320_v10 = vld [vmem:[%s6725_s7 + $0x2c8] sm:$0xff]  ;;  %v4326_v16 = vld [vmem:[%s6725_s7 + $0x2f8] sm:$0xff] }
 0x3e7   : > { %v5903_v24 = vpop.f32.mrb[38].mxu1  ;;  %v4940_v22 = vpack.c.bf16 %v4326_v16, %v4324_v15  ;;  %v4266_v15 = vld [vmem:[%s6725_s7 + $0x1b8] sm:$0xff] }
 0x3e8   : > { %4218 = vmatmul.mubr.msk.f32.gmra.mrb[18].mxu0 %vm1878_vm6, %v5903_v24  ;;  %v1854_v27 = vpop.f32.mrb[39].mxu1 }
 0x3e9   : > { %4859 = vmatpush1.bf16.msra.mxu0 %v4858_v17  ;;  %2063 = vmatprep.mubr.f32.mxu0 %v5264_v7  ;;  %v4307_v17 = vld [vmem:[%s6725_s7 + $0x2b0] sm:$0xf]  ;;  %v4328_v27 = vld [vmem:[%s6725_s7 + $0x308] sm:$0xff] }
 0x3ea   : > { %4861 = vmatprep.subr.bf16.mxu0 %v4860_v18  ;;  %v4936_v18 = vpack.c.bf16 %v4322_v11, %v4320_v10  ;;  %v4888_v10 = vpack.c.bf16 %v4262_v6, %v4260_v5  ;;  %v4259_v11 = vld [vmem:[%s6725_s7 + $0x180] sm:$0xff]  ;;  %v2973_v6 = vld [vmem:[%s6728_s10 + $0x28] sm:$0xff] }
 0x3eb   : > { %v4890_v16 = vpack.c.bf16 %v4261_v12, %v4259_v11  ;;  %v2972_v5 = vld [vmem:[%s6728_s10 + $0x20] sm:$0xff] }
 0x3ec   : > { %v2976_v12 = vld [vmem:[%s6728_s10 + $0x40] sm:$0xff] }
 0x3ed   : > { %4863 = vmatpush1.bf16.msra.mxu0 %v4862_v28  ;;  %v4330_v28 = vld [vmem:[%s6725_s7 + $0x318] sm:$0xff] }
 0x3ee   : > { %4865 = vmatprep.subr.bf16.mxu0 %v4864_v29  ;;  %v4942_v29 = vpack.c.bf16 %v4325_v26, %v4323_v25  ;;  %v4944_v30 = vpack.c.bf16 %v4330_v28, %v4328_v27  ;;  %v4265_v25 = vld [vmem:[%s6725_s7 + $0x1b0] sm:$0xff]  ;;  %v4268_v27 = vld [vmem:[%s6725_s7 + $0x1c8] sm:$0xff]  ;;  %v4270_v28 = vld [vmem:[%s6725_s7 + $0x1d8] sm:$0xff] }
 0x3f1   : > { %4867 = vmatpush1.bf16.msra.mxu0 %v4866_v34  ;;  %v4334_v34 = vld [vmem:[%s6725_s7 + $0x338] sm:$0xff] }
 0x3f2   : > { %4869 = vmatprep.subr.bf16.mxu0 %v4868_v35  ;;  %v4946_v35 = vpack.c.bf16 %v4329_v32, %v4327_v31  ;;  %v4948_v36 = vpack.c.bf16 %v4334_v34, %v4332_v33  ;;  %v4896_v31 = vpack.c.bf16 %v4270_v28, %v4268_v27  ;;  %v4267_v32 = vld [vmem:[%s6725_s7 + $0x1c0] sm:$0xff]  ;;  %v4269_v33 = vld [vmem:[%s6725_s7 + $0x1d0] sm:$0xff]  ;;  %v2983_v27 = vld [vmem:[%s6728_s10 + $0x78] sm:$0xff] }
 0x3f5   : > { %4871 = vmatpush1.bf16.msra.mxu0 %v4870_v38  ;;  %v4333_v38 = vld [vmem:[%s6725_s7 + $0x330] sm:$0xff] }
 0x3f6   : > { %4241 = vmatprep.subr.msk.mxu0 %vm1669_vm1, %v4240_v39  ;;  %v4336_v39 = vld [vmem:[%s6725_s7 + $0x348] sm:$0xff]  ;;  %v4950_v41 = vpack.c.bf16 %v4333_v38, %v4331_v37  ;;  %v4274_v37 = vld [vmem:[%s6725_s7 + $0x1f8] sm:$0xff] }
 0x3f7   : > { %v4952_v42 = vpack.c.bf16 %v4338_v40, %v4336_v39  ;;  %v4898_v39 = vpack.c.bf16 %v4269_v33, %v4267_v32  ;;  %v2865_v32 = vld [vmem:[%s6726_s8] sm:$0x3] }
 0x3f8   : > { %v2870_v33 = vrot.slane %v2865_v32, %v1636_v21 }
 0x3f9   : > { %4242 = vmatpush1.msk.msra.mxu0 %vm1669_vm1, %v4239_v46  ;;  %v4340_v46 = vld [vmem:[%s6725_s7 + $0x368] sm:$0xf] }
 0x3fa   : > { %4243 = vmatmul.mubr.msk.f32.vlgmr.msra.gmra.mrb[20].mxu0 %vm1878_vm6, %v5886_v13  ;;  %4911 = vmatprep.subr.bf16.mxu0 %v4910_v47  ;;  %v4339_v47 = vld [vmem:[%s6725_s7 + $0x360] sm:$0xf] }
 0x3fb   : > { %4913 = vmatpush1.bf16.msra.mxu0 %v4912_v48  ;;  %2069 = vmatprep.mubr.f32.mxu0 %v5264_v7 }
 0x3fc   : > { %4915 = vmatprep.subr.bf16.mxu0 %v4914_v49 }
 0x3fe   : > { %4244 = vmatmul.mubr.msk.f32.gmra.mrb[22].mxu0 %vm1878_vm6, %v5903_v24 }
 0x3ff   : > { %4917 = vmatpush1.bf16.msra.mxu0 %v4916_v54  ;;  %2554 = vmatprep.mubr.f32.mxu0 %v5264_v7 }
 0x400   : > { %4919 = vmatprep.subr.bf16.mxu0 %v4918_v55 }
 0x403   : > { %4921 = vmatpush1.bf16.msra.mxu0 %v4920_v61 }
 0x404   : > { %4923 = vmatprep.subr.bf16.mxu0 %v4922_v62  ;;  %v4256_v62 = vld [vmem:[%s6725_s7 + $0x168] sm:$0xff] }
 0x405   : > { %v4884_v1 = vpack.c.bf16 %v4258_v63, %v4256_v62  ;;  %v4345_v62 = vld [vmem:[%s6724_s6 + $0x40] sm:$0xff] }
 0x406   : > { %v2968_v63 = vld [vmem:[%s6728_s10] sm:$0xff] }
 0x407   : > { %4925 = vmatpush1.bf16.msra.mxu0 %v4924_v3  ;;  %v4255_v3 = vld [vmem:[%s6725_s7 + $0x160] sm:$0xff] }
 0x408   : > { %4927 = vmatprep.subr.bf16.mxu0 %v4926_v4  ;;  %v4257_v4 = vld [vmem:[%s6725_s7 + $0x170] sm:$0xff] }
 0x40b   : > { %4929 = vmatpush1.bf16.msra.mxu0 %v4928_v8  ;;  %v1968_v8 = vld [vmem:[%s6724_s6] sm:$0xff] }
 0x40c   : > { %4309 = vmatprep.subr.msk.mxu0 %vm1669_vm1, %v4308_v9  ;;  %v4886_v9 = vpack.c.bf16 %v4257_v4, %v4255_v3  ;;  %v2971_v3 = vld [vmem:[%s6728_s10 + $0x18] sm:$0xff] }
 0x40f   : > { %4310 = vmatpush1.msk.msra.mxu0 %vm1669_vm1, %v4307_v17  ;;  %v1969_v17 = vld [vmem:[%s6724_s6 + $0x8] sm:$0x3] }
 0x410   : > { %4311 = vmatmul.mubr.msk.f32.vlgmr.msra.gmra.mrb[24].mxu0 %vm1878_vm6, %v5886_v13  ;;  %4937 = vmatprep.subr.bf16.mxu0 %v4936_v18 }
 0x411   : > { %4939 = vmatpush1.bf16.msra.mxu0 %v4938_v19  ;;  %2560 = vmatprep.mubr.f32.mxu0 %v5264_v7  ;;  %v4892_v19 = vpack.c.bf16 %v4266_v15, %v4264_v14  ;;  %v2977_v14 = vld [vmem:[%s6728_s10 + $0x48] sm:$0xff] }
 0x412   : > { %4941 = vmatprep.subr.bf16.mxu0 %v4940_v22  ;;  %v4263_v22 = vld [vmem:[%s6725_s7 + $0x1a0] sm:$0xff]  ;;  %v4981_v15 = vpack.c.bf16 %v2977_v14, %v2976_v12  ;;  %v4361_v12 = vld [vmem:[%s6730_s12 + $0x78] sm:$0xff] }
 0x414   : > { %4312 = vmatmul.mubr.msk.f32.gmra.mrb[26].mxu0 %vm1878_vm6, %v5903_v24 }
 0x415   : > { %4943 = vmatpush1.bf16.msra.mxu0 %v4942_v29  ;;  %2756 = vmatprep.mubr.f32.mxu0 %v5264_v7  ;;  %v4894_v29 = vpack.c.bf16 %v4265_v25, %v4263_v22  ;;  %v2981_v22 = vld [vmem:[%s6728_s10 + $0x68] sm:$0xff] }
 0x416   : > { %4945 = vmatprep.subr.bf16.mxu0 %v4944_v30 }
 0x419   : > { %4947 = vmatpush1.bf16.msra.mxu0 %v4946_v35 }
 0x41a   : > { %4949 = vmatprep.subr.bf16.mxu0 %v4948_v36  ;;  %v4272_v36 = vld [vmem:[%s6725_s7 + $0x1e8] sm:$0xff] }
 0x41b   : > { %v4900_v40 = vpack.c.bf16 %v4274_v37, %v4272_v36 }
 0x41d   : > { %4951 = vmatpush1.bf16.msra.mxu0 %v4950_v41  ;;  %v4271_v41 = vld [vmem:[%s6725_s7 + $0x1e0] sm:$0xff] }
 0x41e   : > { %4953 = vmatprep.subr.bf16.mxu0 %v4952_v42  ;;  %v4273_v42 = vld [vmem:[%s6725_s7 + $0x1f0] sm:$0xff] }
 0x41f   : > { %v4902_v43 = vpack.c.bf16 %v4273_v42, %v4271_v41 }
 0x421   : > { %4955 = vmatpush1.bf16.msra.mxu0 %v4954_v45  ;;  %v4275_v45 = vld [vmem:[%s6725_s7 + $0x200] sm:$0xf] }
 0x422   : > { %4341 = vmatprep.subr.msk.mxu0 %vm1669_vm1, %v4340_v46 }
 0x425   : > { %4342 = vmatpush1.msk.msra.mxu0 %vm1669_vm1, %v4339_v47 }
 0x426   : > { %4343 = vmatmul.mubr.msk.f32.vlgmr.msra.gmra.mrb[28].mxu0 %vm1878_vm6, %v5886_v13 }
 0x427   : > { %2762 = vmatprep.mubr.f32.mxu0 %v5264_v7 }
 0x42a   : > { %4344 = vmatmul.mubr.msk.f32.gmra.mrb[30].mxu0 %vm1878_vm6, %v5903_v24 }
 0x42b   : > { %2961 = vmatprep.mubr.f32.mxu0 %v5264_v7 }
 0x4b7   : > { %v1957_v48 = vpop.f32.mrb[16].mxu0 }
 0x4b8   : > { %v1959_v49 = vpop.f32.mrb[17].mxu0 }
 0x4bb   : > { %v1963_v50 = vpop.f32.mrb[18].mxu0 }
 0x4bc   : > { %v4881_v51 = vpack.c.bf16 %v1963_v50, %v1957_v48  ;;  %v1965_v52 = vpop.f32.mrb[19].mxu0 }
 0x4bd   : > { %v4878_v53 = vpack.c.bf16 %v1965_v52, %v1959_v49 }
 0x4cd   : > { %v2065_v54 = vpop.f32.mrb[20].mxu0 }
 0x4ce   : > { %v2067_v55 = vpop.f32.mrb[21].mxu0 }
 0x4d1   : > { %v2071_v56 = vpop.f32.mrb[22].mxu0 }
 0x4d2   : > { %v4875_v59 = vpack.c.bf16 %v2071_v56, %v2065_v54  ;;  %v2073_v60 = vpop.f32.mrb[23].mxu0 }
 0x4d3   : > { %v4872_v61 = vpack.c.bf16 %v2073_v60, %v2067_v55  ;;  %v4313_v60 = vld [vmem:[%s6724_s6 + $0x30] sm:$0xff] }
 0x4d5   : > { %4874 = vmatprep.subr.msk.bf16.mxu1 %vm6095_vm8, %v4872_v61  ;;  %v4314_v61 = vld [vmem:[%s6724_s6 + $0x38] sm:$0x3] }
 0x4d6   : > { %4877 = vmatpush1.bf16.msk.msra.mxu1 %vm6095_vm8, %v4875_v59 }
 0x4d7   : > { %4880 = vmatprep.subr.msk.bf16.mxu1 %vm6095_vm8, %v4878_v53 }
 0x4d9   : > { %4249 = vmatmul.mubr.msk.f32.vlgmr.msra.gmra.mrb[40].mxu1 %vm2079_vm9, %v4245_v0  ;;  %v2969_v0 = vld [vmem:[%s6728_s10 + $0x8] sm:$0xff] }
 0x4da   : > { %4883 = vmatpush1.bf16.msk.msra.mxu1 %vm6095_vm8, %v4881_v51  ;;  %2163 = vmatprep.mubr.f32.mxu1 %v5264_v7 }
 0x4db   : > { %4885 = vmatprep.subr.bf16.mxu1 %v4884_v1  ;;  %v2970_v1 = vld [vmem:[%s6728_s10 + $0x10] sm:$0xff] }
 0x4dc   : > { %v4972_v4 = vpack.c.bf16 %v2971_v3, %v2970_v1  ;;  %v4357_v3 = vld [vmem:[%s6730_s12 + $0x58] sm:$0xff] }
 0x4dd   : > { %4250 = vmatmul.mubr.msk.f32.gmra.mrb[42].mxu1 %vm2079_vm9, %v4246_v2  ;;  %v4969_v2 = vpack.c.bf16 %v2969_v0, %v2968_v63 }
 0x4de   : > { %2246 = vmatprep.mubr.f32.mxu1 %v5264_v7 }
 0x4e1   : > { %4253 = vmatmul.mubr.msk.f32.vlgmr.msra.gmra.mrb[40].mxu1 %vm2079_vm9, %v1968_v8  ;;  %v4975_v8 = vpack.c.bf16 %v2973_v6, %v2972_v5  ;;  %v4358_v5 = vld [vmem:[%s6730_s12 + $0x60] sm:$0xff]  ;;  %v4359_v6 = vld [vmem:[%s6730_s12 + $0x68] sm:$0xff] }
 0x4e2   : > { %4887 = vmatpush1.bf16.msra.mxu1 %v4886_v9  ;;  %2252 = vmatprep.mubr.f32.mxu1 %v5264_v7  ;;  %v2974_v9 = vld [vmem:[%s6728_s10 + $0x30] sm:$0xff] }
 0x4e3   : > { %v2556_v18 = vpop.f32.mrb[24].mxu0  ;;  %4889 = vmatprep.subr.bf16.mxu1 %v4888_v10  ;;  %v2975_v10 = vld [vmem:[%s6728_s10 + $0x38] sm:$0xff] }
 0x4e4   : > { %v2558_v26 = vpop.f32.mrb[25].mxu0  ;;  %v4978_v11 = vpack.c.bf16 %v2975_v10, %v2974_v9  ;;  %v5017_v10 = vpack.c.bf16 %v4359_v6, %v4358_v5  ;;  %v4392_v5 = vld [vmem:[%s6730_s12 + $0x120] sm:$0xff]  ;;  %v4393_v6 = vld [vmem:[%s6730_s12 + $0x128] sm:$0xff] }
 0x4e5   : > { %4254 = vmatmul.mubr.msk.f32.gmra.mrb[42].mxu1 %vm2079_vm9, %v1969_v17  ;;  %v2979_v17 = vld [vmem:[%s6728_s10 + $0x58] sm:$0xff] }
 0x4e6   : > { %4891 = vmatpush1.bf16.msra.mxu1 %v4890_v16  ;;  %2352 = vmatprep.mubr.f32.mxu1 %v5264_v7  ;;  %v2978_v16 = vld [vmem:[%s6728_s10 + $0x50] sm:$0xff] }
 0x4e7   : > { %v2562_v30 = vpop.f32.mrb[26].mxu0  ;;  %4893 = vmatprep.subr.bf16.mxu1 %v4892_v19  ;;  %v2980_v19 = vld [vmem:[%s6728_s10 + $0x60] sm:$0xff] }
 0x4e8   : > { %v4933_v34 = vpack.c.bf16 %v2562_v30, %v2556_v18  ;;  %v2564_v35 = vpop.f32.mrb[27].mxu0  ;;  %v4984_v18 = vpack.c.bf16 %v2979_v17, %v2978_v16  ;;  %v4987_v25 = vpack.c.bf16 %v2981_v22, %v2980_v19  ;;  %v2985_v30 = vld [vmem:[%s6728_s10 + $0x88] sm:$0xff]  ;;  %v4365_v19 = vld [vmem:[%s6730_s12 + $0x98] sm:$0xff] }
 0x4e9   : > { %v4930_v38 = vpack.c.bf16 %v2564_v35, %v2558_v26  ;;  %v2982_v26 = vld [vmem:[%s6728_s10 + $0x70] sm:$0xff]  ;;  %v2874_v35 = vrot.slane %v2865_v32, %v1640_v23  ;;  %v4363_v16 = vld [vmem:[%s6730_s12 + $0x88] sm:$0xff] }
 0x4ea   : > { %4895 = vmatpush1.bf16.msra.mxu1 %v4894_v29  ;;  %v4990_v28 = vpack.c.bf16 %v2983_v27, %v2982_v26  ;;  %v2984_v29 = vld [vmem:[%s6728_s10 + $0x80] sm:$0xff]  ;;  %v2986_v23 = vld [vmem:[%s6728_s10 + $0x90] sm:$0xff]  ;;  %v4373_v26 = vld [vmem:[%s6730_s12 + $0xa8] sm:$0xff] }
 0x4eb   : > { %4897 = vmatprep.subr.bf16.mxu1 %v4896_v31  ;;  %v4993_v31 = vpack.c.bf16 %v2985_v30, %v2984_v29  ;;  %v4375_v29 = vld [vmem:[%s6730_s12 + $0xb8] sm:$0xff]  ;;  %v4377_v32 = vld [vmem:[%s6730_s12 + $0xc8] sm:$0xff] }
 0x4ee   : > { %4899 = vmatpush1.bf16.msra.mxu1 %v4898_v39 }
 0x4ef   : > { %4901 = vmatprep.subr.bf16.mxu1 %v4900_v40 }
 0x4f2   : > { %4903 = vmatpush1.bf16.msra.mxu1 %v4902_v43 }
 0x4f3   : > { %4277 = vmatprep.subr.msk.mxu1 %vm1669_vm1, %v4276_v44 }
 0x4f6   : > { %4278 = vmatpush1.msk.msra.mxu1 %vm1669_vm1, %v4275_v45 }
 0x4f7   : > { %4279 = vmatmul.mubr.msk.f32.vlgmr.msra.gmra.mrb[44].mxu1 %vm1878_vm6, %v5886_v13  ;;  %v4281_v13 = vld [vmem:[%s6724_s6 + $0x20] sm:$0xff] }
 0x4f8   : > { %2358 = vmatprep.mubr.f32.mxu1 %v5264_v7 }
 0x4f9   : > { %v2758_v46 = vpop.f32.mrb[28].mxu0 }
 0x4fa   : > { %v2760_v47 = vpop.f32.mrb[29].mxu0 }
 0x4fb   : > { %4280 = vmatmul.mubr.msk.f32.gmra.mrb[46].mxu1 %vm1878_vm6, %v5903_v24  ;;  %v4282_v24 = vld [vmem:[%s6724_s6 + $0x28] sm:$0x3] }
 0x4fc   : > { %2444 = vmatprep.mubr.f32.mxu1 %v5264_v7 }
 0x4fd   : > { %v2764_v48 = vpop.f32.mrb[30].mxu0 }
 0x4fe   : > { %v4959_v49 = vpack.c.bf16 %v2764_v48, %v2758_v46  ;;  %v2766_v50 = vpop.f32.mrb[31].mxu0  ;;  %v2987_v48 = vld [vmem:[%s6728_s10 + $0x98] sm:$0xff] }
 0x4ff   : > { %v4956_v51 = vpack.c.bf16 %v2766_v50, %v2760_v47  ;;  %v3061_v50 = vld [vmem:[%s6730_s12] sm:$0xff] }
 0x5ca   : > { %v2354_v52 = vpop.f32.mrb[44].mxu1 }
 0x5cb   : > { %v2356_v53 = vpop.f32.mrb[45].mxu1 }
 0x5ce   : > { %v2360_v54 = vpop.f32.mrb[46].mxu1 }
 0x5cf   : > { %v4907_v55 = vpack.c.bf16 %v2360_v54, %v2354_v52  ;;  %v2362_v56 = vpop.f32.mrb[47].mxu1  ;;  %v3063_v52 = vld [vmem:[%s6730_s12 + $0x10] sm:$0xff]  ;;  %v3064_v54 = vld [vmem:[%s6730_s12 + $0x18] sm:$0xff] }
 0x5d0   : > { %v4904_v59 = vpack.c.bf16 %v2362_v56, %v2356_v53  ;;  %v3065_v56 = vld [vmem:[%s6730_s12 + $0x20] sm:$0xff] }
 0x5d2   : > { %4906 = vmatprep.subr.msk.bf16.mxu1 %vm6095_vm8, %v4904_v59  ;;  %v3066_v59 = vld [vmem:[%s6730_s12 + $0x28] sm:$0xff] }
 0x5d3   : > { %4909 = vmatpush1.bf16.msk.msra.mxu1 %vm6095_vm8, %v4907_v55  ;;  %v5002_v55 = vpack.c.bf16 %v3064_v54, %v3063_v52  ;;  %v4367_v54 = vld [vmem:[%s6729_s11 + $0x1] sm:$0x1] }
 0x5d4   : > { %4932 = vmatprep.subr.msk.bf16.mxu1 %vm6095_vm8, %v4930_v38 }
 0x5d6   : > { %4285 = vmatmul.mubr.msk.f32.vlgmr.msra.gmra.mrb[40].mxu1 %vm2079_vm9, %v4281_v13  ;;  %v5005_v13 = vpack.c.bf16 %v3066_v59, %v3065_v56  ;;  %v3145_v59 = vld [vmem:[%s6729_s11] sm:$0x1] }
 0x5d7   : > { %4935 = vmatpush1.bf16.msk.msra.mxu1 %vm6095_vm8, %v4933_v34  ;;  %2450 = vmatprep.mubr.f32.mxu1 %v5264_v7 }
 0x5d8   : > { %4958 = vmatprep.subr.msk.bf16.mxu1 %vm6095_vm8, %v4956_v51  ;;  %v3062_v51 = vld [vmem:[%s6730_s12 + $0x8] sm:$0xff] }
 0x5d9   : > { %v4999_v53 = vpack.c.bf16 %v3062_v51, %v3061_v50  ;;  %v4409_v50 = vld [vmem:[%s6730_s12 + $0x188] sm:$0xff] }
 0x5da   : > { %4286 = vmatmul.mubr.msk.f32.gmra.mrb[42].mxu1 %vm2079_vm9, %v4282_v24  ;;  %v3067_v24 = vld [vmem:[%s6730_s12 + $0x30] sm:$0xff] }
 0x5db   : > { %2646 = vmatprep.mubr.f32.mxu1 %v5264_v7 }
 0x5de   : > { %4317 = vmatmul.mubr.msk.f32.vlgmr.msra.gmra.mrb[40].mxu1 %vm2079_vm9, %v4313_v60  ;;  %v3068_v60 = vld [vmem:[%s6730_s12 + $0x38] sm:$0xff] }
 0x5df   : > { %4961 = vmatpush1.bf16.msk.msra.mxu1 %vm6095_vm8, %v4959_v49  ;;  %2652 = vmatprep.mubr.f32.mxu1 %v5264_v7  ;;  %v4996_v49 = vpack.c.bf16 %v2987_v48, %v2986_v23  ;;  %v4407_v23 = vld [vmem:[%s6730_s12 + $0x178] sm:$0xff] }
 0x5e0   : > { %4968 = vmatprep.subr.bf16.mxu1 %v5266_v58 }
 0x5e2   : > { %4318 = vmatmul.mubr.msk.f32.gmra.mrb[42].mxu1 %vm2079_vm9, %v4314_v61  ;;  %v5008_v61 = vpack.c.bf16 %v3068_v60, %v3067_v24  ;;  %v4387_v24 = vld [vmem:[%s6730_s12 + $0xf8] sm:$0xff]  ;;  %v4383_v60 = vld [vmem:[%s6729_s11 + $0x2] sm:$0x1] }
 0x5e3   : > { %2848 = vmatprep.mubr.f32.mxu1 %v5264_v7 }
 0x5e6   : > { %4349 = vmatmul.mubr.msk.f32.vlgmr.msra.gmra.mrb[40].mxu1 %vm2079_vm9, %v4345_v62  ;;  %v3069_v62 = vld [vmem:[%s6730_s12 + $0x40] sm:$0xff] }
 0x5e7   : > { %2854 = vmatprep.mubr.f32.mxu1 %v5264_v7  ;;  %4970 = vmatpush1.bf16.msra.mxu1 %v4969_v2  ;;  %v4356_v2 = vld [vmem:[%s6730_s12 + $0x50] sm:$0xff] }
 0x5e8   : > { %4971 = vmatprep.subr.bf16.mxu1 %v5266_v58 }
 0x5ea   : > { %4350 = vmatmul.mubr.msk.f32.gmra.mrb[42].mxu1 %vm2079_vm9, %v4346_v57  ;;  %v3070_v57 = vld [vmem:[%s6730_s12 + $0x48] sm:$0xff] }
 0x5eb   : > { %4973 = vmatpush1.bf16.msra.mxu1 %v4972_v4  ;;  %v5011_v63 = vpack.c.bf16 %v3070_v57, %v3069_v62  ;;  %v5014_v4 = vpack.c.bf16 %v4357_v3, %v4356_v2  ;;  %v4388_v57 = vld [vmem:[%s6730_s12 + $0x100] sm:$0xff]  ;;  %v4390_v2 = vld [vmem:[%s6730_s12 + $0x110] sm:$0xff]  ;;  %v4391_v3 = vld [vmem:[%s6730_s12 + $0x118] sm:$0xff] }
 0x5ec   : > { %4974 = vmatprep.subr.bf16.mxu1 %v5266_v58 }
 0x5ef   : > { %4976 = vmatpush1.bf16.msra.mxu1 %v4975_v8 }
 0x5f0   : > { %4977 = vmatprep.subr.bf16.mxu1 %v5266_v58 }
 0x5f3   : > { %4979 = vmatpush1.bf16.msra.mxu1 %v4978_v11  ;;  %v4360_v11 = vld [vmem:[%s6730_s12 + $0x70] sm:$0xff] }
 0x5f4   : > { %4980 = vmatprep.subr.bf16.mxu1 %v5266_v58  ;;  %v5020_v14 = vpack.c.bf16 %v4361_v12, %v4360_v11  ;;  %v4395_v11 = vld [vmem:[%s6730_s12 + $0x138] sm:$0xff] }
 0x5f7   : > { %4982 = vmatpush1.bf16.msra.mxu1 %v4981_v15  ;;  %v4362_v15 = vld [vmem:[%s6730_s12 + $0x80] sm:$0xff] }
 0x5f8   : > { %4983 = vmatprep.subr.bf16.mxu1 %v5266_v58  ;;  %v5023_v17 = vpack.c.bf16 %v4363_v16, %v4362_v15 }
 0x5fb   : > { %4985 = vmatpush1.bf16.msra.mxu1 %v4984_v18  ;;  %v4364_v18 = vld [vmem:[%s6730_s12 + $0x90] sm:$0xff] }
 0x5fc   : > { %4986 = vmatprep.subr.bf16.mxu1 %v5266_v58  ;;  %v5026_v22 = vpack.c.bf16 %v4365_v19, %v4364_v18 }
 0x5ff   : > { %4988 = vmatpush1.bf16.msra.mxu1 %v4987_v25  ;;  %v4372_v25 = vld [vmem:[%s6730_s12 + $0xa0] sm:$0xff] }
 0x600   : > { %4989 = vmatprep.subr.bf16.mxu1 %v5266_v58  ;;  %v5029_v27 = vpack.c.bf16 %v4373_v26, %v4372_v25 }
 0x603   : > { %4991 = vmatpush1.bf16.msra.mxu1 %v4990_v28  ;;  %v4374_v28 = vld [vmem:[%s6730_s12 + $0xb0] sm:$0xff] }
 0x604   : > { %4992 = vmatprep.subr.bf16.mxu1 %v5266_v58  ;;  %v5032_v30 = vpack.c.bf16 %v4375_v29, %v4374_v28  ;;  %v4397_v28 = vld [vmem:[%s6729_s11 + $0x3] sm:$0x1] }
 0x607   : > { %4994 = vmatpush1.bf16.msra.mxu1 %v4993_v31  ;;  %v4376_v31 = vld [vmem:[%s6730_s12 + $0xc0] sm:$0xff] }
 0x608   : > { %4995 = vmatprep.subr.bf16.mxu1 %v5266_v58 }
 0x60b   : > { %4997 = vmatpush1.bf16.msra.mxu1 %v4996_v49  ;;  %v4408_v49 = vld [vmem:[%s6730_s12 + $0x180] sm:$0xff] }
 0x60c   : > { %4560 = vmatprep.subr.mxu1 %v5264_v7  ;;  %v5071_v51 = vpack.c.bf16 %v4409_v50, %v4408_v49  ;;  %v3880_v49 = vld [vmem:[%s6732_s14 + $0x70] sm:$0xff]  ;;  %v3957_v50 = vld [vmem:[%s6734_s16] sm:$0xff] }
 0x6b9   : > { %v2850_v34 = vpop.f32.mrb[40].mxu1 }
 0x6ba   : > { %v2852_v36 = vpop.f32.mrb[41].mxu1  ;;  %v2877_v37 = vadd.f32 %v2870_v33, %v2850_v34  ;;  %v4378_v34 = vld [vmem:[%s6730_s12 + $0xd0] sm:$0xff] }
 0x6bb   : > { %v2878_v38 = vadd.f32 %v2874_v35, %v2852_v36 }
 0x6bc   : > { %v2881_v43 = vmax.f32 %v2877_v37, 0.0  ;;  %v4380_v37 = vld [vmem:[%s6730_s12 + $0xe0] sm:$0xff] }
 0x6bd   : > { %v2856_v39 = vpop.f32.mrb[42].mxu1  ;;  %v2882_v45 = vmax.f32 %v2878_v38, 0.0  ;;  %v4381_v38 = vld [vmem:[%s6730_s12 + $0xe8] sm:$0xff] }
 0x6be   : > { %v2879_v40 = vadd.f32 %v2870_v33, %v2856_v39  ;;  %v2858_v41 = vpop.f32.mrb[43].mxu1  ;;  %v5035_v33 = vpack.c.bf16 %v4377_v32, %v4376_v31  ;;  %v5041_v39 = vpack.c.bf16 %v4381_v38, %v4380_v37  ;;  %v4411_v32 = vld [vmem:[%s6729_s11 + $0x4] sm:$0x1]  ;;  %v3871_v38 = vld [vmem:[%s6732_s14 + $0x28] sm:$0xff] }
 0x6bf   : > { %v2880_v42 = vadd.f32 %v2874_v35, %v2858_v41  ;;  %v4379_v35 = vld [vmem:[%s6730_s12 + $0xd8] sm:$0xff]  ;;  %v4401_v41 = vld [vmem:[%s6730_s12 + $0x148] sm:$0xff]  ;;  %v3870_v37 = vld [vmem:[%s6732_s14 + $0x20] sm:$0xff] }
 0x6c0   : > { %v2883_v44 = vmax.f32 %v2879_v40, 0.0  ;;  %v5038_v36 = vpack.c.bf16 %v4379_v35, %v4378_v34  ;;  %v4400_v40 = vld [vmem:[%s6730_s12 + $0x140] sm:$0xff]  ;;  %v3868_v34 = vld [vmem:[%s6732_s14 + $0x10] sm:$0xff]  ;;  %v3869_v35 = vld [vmem:[%s6732_s14 + $0x18] sm:$0xff] }
 0x6c1   : > { %v2884_v46 = vmax.f32 %v2880_v42, 0.0  ;;  %v5059_v42 = vpack.c.bf16 %v4401_v41, %v4400_v40  ;;  %v3872_v40 = vld [vmem:[%s6732_s14 + $0x30] sm:$0xff]  ;;  %v3873_v41 = vld [vmem:[%s6732_s14 + $0x38] sm:$0xff] }
 0x6c2   : > { %v4965_v47 = vpack.c.bf16 %v2883_v44, %v2881_v43  ;;  %v4402_v43 = vld [vmem:[%s6730_s12 + $0x150] sm:$0xff]  ;;  %v4403_v44 = vld [vmem:[%s6730_s12 + $0x158] sm:$0xff] }
 0x6c3   : > { %v4962_v21 = vpack.c.bf16 %v2884_v46, %v2882_v45  ;;  %v5062_v45 = vpack.c.bf16 %v4403_v44, %v4402_v43  ;;  %v4404_v46 = vld [vmem:[%s6730_s12 + $0x160] sm:$0xff]  ;;  %v3875_v44 = vld [vmem:[%s6732_s14 + $0x48] sm:$0xff] }
 0x6c4   : > { %v3874_v43 = vld [vmem:[%s6732_s14 + $0x40] sm:$0xff] }
 0x6c5   : > { %4964 = vmatprep.subr.msk.bf16.mxu0 %vm4963_vm11, %v4962_v21 }
 0x6c6   : > { %4967 = vmatpush1.bf16.msk.msra.mxu0 %vm4963_vm11, %v4965_v47  ;;  %v4405_v47 = vld [vmem:[%s6730_s12 + $0x168] sm:$0xff] }
 0x6c7   : > { %4998 = vmatprep.subr.bf16.mxu0 %v5266_v58  ;;  %v5065_v21 = vpack.c.bf16 %v4405_v47, %v4404_v46  ;;  %v3876_v46 = vld [vmem:[%s6732_s14 + $0x50] sm:$0xff]  ;;  %v3877_v47 = vld [vmem:[%s6732_s14 + $0x58] sm:$0xff] }
 0x6c9   : > { %4353 = vmatmul.mubr.msk.f32.vlgmr.msra.gmra.mrb[32].mxu0 %vm2886_vm12, %v2885_v20  ;;  %v4406_v20 = vld [vmem:[%s6730_s12 + $0x170] sm:$0xff] }
 0x6ca   : > { %5000 = vmatpush3.bf16.msra.mxu0 %v4999_v53  ;;  %4534 = vmatprep.mubr.msk.f32.mxu0 %vm5267_vm13, %v5264_v7  ;;  %v5068_v48 = vpack.c.bf16 %v4407_v23, %v4406_v20  ;;  %v3878_v20 = vld [vmem:[%s6732_s14 + $0x60] sm:$0xff]  ;;  %v3879_v23 = vld [vmem:[%s6732_s14 + $0x68] sm:$0xff] }
 0x6cb   : > { %5001 = vmatprep.subr.bf16.mxu0 %v5266_v58 }
 0x6ce   : > { %5003 = vmatpush3.bf16.msra.mxu0 %v5002_v55 }
 0x6cf   : > { %5004 = vmatprep.subr.bf16.mxu0 %v5266_v58 }
 0x6d2   : > { %5006 = vmatpush3.bf16.msra.mxu0 %v5005_v13  ;;  %v4386_v13 = vld [vmem:[%s6730_s12 + $0xf0] sm:$0xff] }
 0x6d3   : > { %5007 = vmatprep.subr.bf16.mxu0 %v5266_v58 }
 0x6d6   : > { %5009 = vmatpush3.bf16.msra.mxu0 %v5008_v61  ;;  %v5044_v61 = vpack.c.bf16 %v4387_v24, %v4386_v13  ;;  %v3963_v24 = vld [vmem:[%s6734_s16 + $0x30] sm:$0xff] }
 0x6d7   : > { %5010 = vmatprep.subr.bf16.mxu0 %v5266_v58 }
 0x6da   : > { %5012 = vmatpush3.bf16.msra.mxu0 %v5011_v63  ;;  %v4389_v63 = vld [vmem:[%s6730_s12 + $0x108] sm:$0xff] }
 0x6db   : > { %5013 = vmatprep.subr.bf16.mxu0 %v5266_v58 }
 0x79c   : > { %v2963_v0 = vpop.f32.mrb[32].mxu0 }
 0x79d   : > { %v2965_v1 = vpop.f32.mrb[33].mxu0 }
 0x79e   : > { %4354 = vmatprep.mubr.msk.f32.mxu1 %vm585_vm0, %v2965_v1  ;;  %vm3229_vm0 = vcmask 39936   ;;  %v5047_v1 = vpack.c.bf16 %v4389_v63, %v4388_v57 }
 0x79f   : > { %3056 = vmatmul.mubr.f32.vlgmr.msra.gmra.mrb[48].mxu1 %v2963_v0 }
 0x7a0   : > { %4562 = vmatprep.mubr.msk.f32.mxu1 %vm5267_vm13, %v5264_v7 }
 0x872   : > { %v6377_v8 = vpop.f32.mrb[48].mxu1 }
 0x873   : > { %v3059_v9 = vpop.f32.mrb[49].mxu1  ;;  %4535 = vmatmul.mubr.msk.f32.vlgmr.msra.gmra.mrb[34].mxu0 %vm3071_vm14, %v6377_v8 }
 0x874   : > { %5015 = vmatpush3.bf16.msra.mxu0 %v5014_v4  ;;  %4557 = vmatprep.mubr.msk.f32.mxu0 %vm5267_vm13, %v5264_v7  ;;  %v5050_v4 = vpack.c.bf16 %v4391_v3, %v4390_v2  ;;  %v5053_v9 = vpack.c.bf16 %v4393_v6, %v4392_v5  ;;  %v3966_v6 = vld [vmem:[%s6734_s16 + $0x48] sm:$0xff] }
 0x875   : > { %5016 = vmatprep.subr.bf16.mxu0 %v5266_v58 }
 0x878   : > { %5018 = vmatpush3.bf16.msra.mxu0 %v5017_v10  ;;  %v4394_v10 = vld [vmem:[%s6730_s12 + $0x130] sm:$0xff] }
 0x879   : > { %5019 = vmatprep.subr.bf16.mxu0 %v5266_v58  ;;  %v5056_v12 = vpack.c.bf16 %v4395_v11, %v4394_v10  ;;  %v3967_v10 = vld [vmem:[%s6734_s16 + $0x50] sm:$0xf]  ;;  %v3881_v11 = vld [vmem:[%s6733_s15] sm:$0x1] }
 0x87c   : > { %5021 = vmatpush3.bf16.msra.mxu0 %v5020_v14 }
 0x87d   : > { %5022 = vmatprep.subr.bf16.mxu0 %v5266_v58 }
 0x880   : > { %5024 = vmatpush3.bf16.msra.mxu0 %v5023_v17 }
 0x881   : > { %5025 = vmatprep.subr.bf16.mxu0 %v5266_v58 }
 0x884   : > { %5027 = vmatpush3.bf16.msra.mxu0 %v5026_v22 }
 0x885   : > { %5028 = vmatprep.subr.bf16.mxu0 %v5266_v58 }
 0x887   : > { %4558 = vmatmul.mubr.msk.f32.vlgmr.msra.gmra.mrb[36].mxu0 %vm3071_vm14, %v6377_v8 }
 0x888   : > { %5030 = vmatpush3.bf16.msra.mxu0 %v5029_v27  ;;  %4590 = vmatprep.mubr.msk.f32.mxu0 %vm5267_vm13, %v5264_v7 }
 0x889   : > { %5031 = vmatprep.subr.bf16.mxu0 %v5266_v58 }
 0x88c   : > { %5033 = vmatpush3.bf16.msra.mxu0 %v5032_v30  ;;  %v3867_v30 = vld [vmem:[%s6732_s14 + $0x8] sm:$0xff] }
 0x88d   : > { %5034 = vmatprep.subr.bf16.mxu0 %v5266_v58 }
 0x890   : > { %5036 = vmatpush3.bf16.msra.mxu0 %v5035_v33 }
 0x891   : > { %5037 = vmatprep.subr.bf16.mxu0 %v5266_v58 }
 0x894   : > { %5039 = vmatpush3.bf16.msra.mxu0 %v5038_v36  ;;  %v5077_v36 = vpack.c.bf16 %v3869_v35, %v3868_v34 }
 0x895   : > { %5040 = vmatprep.subr.bf16.mxu0 %v5266_v58 }
 0x898   : > { %5042 = vmatpush3.bf16.msra.mxu0 %v5041_v39  ;;  %v5080_v39 = vpack.c.bf16 %v3871_v38, %v3870_v37 }
 0x899   : > { %5058 = vmatprep.subr.bf16.mxu0 %v5266_v58 }
 0x89b   : > { %4591 = vmatmul.mubr.msk.f32.vlgmr.msra.gmra.mrb[38].mxu0 %vm3071_vm14, %v6377_v8 }
 0x89c   : > { %5060 = vmatpush3.bf16.msra.mxu0 %v5059_v42  ;;  %4646 = vmatprep.mubr.msk.f32.mxu0 %vm5267_vm13, %v5264_v7  ;;  %v5083_v42 = vpack.c.bf16 %v3873_v41, %v3872_v40 }
 0x89d   : > { %5061 = vmatprep.subr.bf16.mxu0 %v5266_v58 }
 0x8a0   : > { %5063 = vmatpush3.bf16.msra.mxu0 %v5062_v45  ;;  %v5086_v45 = vpack.c.bf16 %v3875_v44, %v3874_v43 }
 0x8a1   : > { %5064 = vmatprep.subr.bf16.mxu0 %v5266_v58 }
 0x8a4   : > { %5066 = vmatpush3.bf16.msra.mxu0 %v5065_v21  ;;  %v5089_v21 = vpack.c.bf16 %v3877_v47, %v3876_v46 }
 0x8a5   : > { %5067 = vmatprep.subr.bf16.mxu0 %v5266_v58 }
 0x8a8   : > { %5069 = vmatpush3.bf16.msra.mxu0 %v5068_v48  ;;  %v5092_v48 = vpack.c.bf16 %v3879_v23, %v3878_v20 }
 0x8a9   : > { %5070 = vmatprep.subr.bf16.mxu0 %v5266_v58 }
 0x8ac   : > { %5072 = vmatpush3.bf16.msra.mxu0 %v5071_v51  ;;  %v3958_v51 = vld [vmem:[%s6734_s16 + $0x8] sm:$0xff] }
 0x8ad   : > { %5094 = vmatprep.subr.bf16.mxu0 %v5266_v58 }
 0x8af   : > { %4647 = vmatmul.mubr.msk.f32.vlgmr.msra.gmra.mrb[40].mxu0 %vm3071_vm14, %v6377_v8 }
 0x8b0   : > { %4709 = vmatprep.mubr.msk.f32.mxu0 %vm5267_vm13, %v5264_v7 }
 0x946   : > { %v3141_v52 = vpop.f32.mrb[34].mxu0 }
 0x947   : > { %v4536_v53 = vpop.f32.mrb[35].mxu0 }
 0x948   : > { %v5095_v53 = vpack.c.bf16 %v3958_v51, %v3957_v50 }
 0x94a   : > { %5096 = vmatpush3.bf16.msra.mxu0 %v5095_v53 }
 0x94b   : > { %5097 = vmatprep.subr.bf16.mxu0 %v5266_v58 }
 0x95a   : > { %v3223_v55 = vpop.f32.mrb[36].mxu0 }
 0x95b   : > { %v4559_v56 = vpop.f32.mrb[37].mxu0  ;;  %4561 = vmatpush3.msk.msra.mxu1 %vm3233_vm15, %v3223_v55 }
 0x95c   : > { %4565 = vmatprep.subr.mxu1 %v5264_v7  ;;  %4563 = vmatmul.mubr.msk.f32.vlgmr.msra.gmra.mrb[50].mxu1 %vm3229_vm0, %v4367_v54  ;;  %v3960_v54 = vld [vmem:[%s6734_s16 + $0x18] sm:$0xff]  ;;  %v3961_v56 = vld [vmem:[%s6734_s16 + $0x20] sm:$0xff] }
 0x95d   : > { %4566 = vmatpush3.msk.msra.mxu1 %vm3233_vm15, %v3141_v52  ;;  %4567 = vmatprep.mubr.msk.f32.mxu1 %vm5267_vm13, %v5264_v7  ;;  %v3959_v52 = vld [vmem:[%s6734_s16 + $0x10] sm:$0xff] }
 0x95e   : > { %4593 = vmatprep.subr.mxu1 %v5264_v7  ;;  %v5098_v55 = vpack.c.bf16 %v3960_v54, %v3959_v52 }
 0x960   : > { %4568 = vmatmul.mubr.msk.f32.vlgmr.msra.gmra.mrb[52].mxu1 %vm3229_vm0, %v3145_v59  ;;  %v3962_v59 = vld [vmem:[%s6734_s16 + $0x28] sm:$0xff]  ;;  %5099 = vmatpush3.bf16.msra.mxu0 %v5098_v55 }
 0x961   : > { %4595 = vmatprep.mubr.msk.f32.mxu1 %vm5267_vm13, %v5264_v7  ;;  %v5101_v13 = vpack.c.bf16 %v3962_v59, %v3961_v56  ;;  %5100 = vmatprep.subr.bf16.mxu0 %v5266_v58 }
 0x964   : > { %5102 = vmatpush3.bf16.msra.mxu0 %v5101_v13 }
 0x965   : > { %5103 = vmatprep.subr.bf16.mxu0 %v5266_v58 }
 0x96e   : > { %v3460_v62 = vpop.f32.mrb[38].mxu0 }
 0x96f   : > { %v4592_v0 = vpop.f32.mrb[39].mxu0  ;;  %4594 = vmatpush3.msk.msra.mxu1 %vm3233_vm15, %v3460_v62 }
 0x970   : > { %4596 = vmatmul.mubr.msk.f32.vlgmr.msra.gmra.mrb[54].mxu1 %vm3229_vm0, %v4383_v60  ;;  %5043 = vmatprep.subr.bf16.mxu1 %v5266_v58  ;;  %v3964_v60 = vld [vmem:[%s6734_s16 + $0x38] sm:$0xff] }
 0x971   : > { %5045 = vmatpush3.bf16.msra.mxu1 %v5044_v61  ;;  %4618 = vmatprep.mubr.msk.f32.mxu1 %vm5267_vm13, %v5264_v7  ;;  %v5104_v61 = vpack.c.bf16 %v3964_v60, %v3963_v24 }
 0x972   : > { %5046 = vmatprep.subr.bf16.mxu1 %v5266_v58 }
 0x973   : > { %5105 = vmatpush3.bf16.msra.mxu0 %v5104_v61 }
 0x974   : > { %5106 = vmatprep.subr.bf16.mxu0 %v5266_v58 }
 0x975   : > { %5048 = vmatpush3.bf16.msra.mxu1 %v5047_v1  ;;  %v3863_v1 = vld [vmem:[%s6731_s13] sm:$0x1] }
 0x976   : > { %5049 = vmatprep.subr.bf16.mxu1 %v5266_v58 }
 0x979   : > { %5051 = vmatpush3.bf16.msra.mxu1 %v5050_v4 }
 0x97a   : > { %5052 = vmatprep.subr.bf16.mxu1 %v5266_v58 }
 0x97d   : > { %5054 = vmatpush3.bf16.msra.mxu1 %v5053_v9 }
 0x97e   : > { %5055 = vmatprep.subr.bf16.mxu1 %v5266_v58 }
 0x981   : > { %5057 = vmatpush3.bf16.msra.mxu1 %v5056_v12 }
 0x982   : > { %v3780_v14 = vpop.f32.mrb[40].mxu0  ;;  %4621 = vmatprep.subr.mxu1 %v5264_v7 }
 0x983   : > { %v4648_v15 = vpop.f32.mrb[41].mxu0 }
 0x984   : > { %4619 = vmatmul.mubr.msk.f32.vlgmr.msra.gmra.mrb[56].mxu1 %vm3071_vm14, %v6377_v8  ;;  %v3866_v8 = vld [vmem:[%s6732_s14] sm:$0xff] }
 0x985   : > { %4623 = vmatprep.mubr.msk.f32.mxu1 %vm5267_vm13, %v5264_v7  ;;  %v5074_v33 = vpack.c.bf16 %v3867_v30, %v3866_v8 }
 0xa2f   : > { %v3303_v16 = vpop.f32.mrb[50].mxu1 }
 0xa30   : > { %v4564_v17 = vpop.f32.mrb[51].mxu1 }
 0xa33   : > { %v3379_v18 = vpop.f32.mrb[52].mxu1 }
 0xa34   : > { %v3380_v19 = vadd.f32 %v3379_v18, %v3303_v16  ;;  %v4569_v22 = vpop.f32.mrb[53].mxu1 }
 0xa43   : > { %v3538_v25 = vpop.f32.mrb[54].mxu1 }
 0xa44   : > { %v6551_v26 = vadd.f32 %v3538_v25, %v3380_v19  ;;  %v4597_v27 = vpop.f32.mrb[55].mxu1 }
 0xa57   : > { %v3620_v29 = vpop.f32.mrb[56].mxu1 }
 0xa58   : > { %v4620_v31 = vpop.f32.mrb[57].mxu1  ;;  %4622 = vmatpush3.msk.msra.mxu1 %vm3233_vm15, %v3620_v29 }
 0xa59   : > { %4624 = vmatmul.mubr.msk.f32.vlgmr.msra.gmra.mrb[58].mxu1 %vm3229_vm0, %v4397_v28  ;;  %4649 = vmatprep.subr.mxu1 %v5264_v7 }
 0xa5a   : > { %4650 = vmatpush3.msk.msra.mxu1 %vm3233_vm15, %v3780_v14  ;;  %4651 = vmatprep.mubr.msk.f32.mxu1 %vm5267_vm13, %v5264_v7 }
 0xa5b   : > { %5073 = vmatprep.subr.bf16.mxu1 %v5266_v58 }
 0xa5d   : > { %4652 = vmatmul.mubr.msk.f32.vlgmr.msra.gmra.mrb[60].mxu1 %vm3229_vm0, %v4411_v32 }
 0xa5e   : > { %5075 = vmatpush3.bf16.msra.mxu1 %v5074_v33  ;;  %4684 = vmatprep.mubr.msk.f32.mxu1 %vm5267_vm13, %v5264_v7 }
 0xa5f   : > { %5076 = vmatprep.subr.bf16.mxu1 %v5266_v58 }
 0xa62   : > { %5078 = vmatpush3.bf16.msra.mxu1 %v5077_v36 }
 0xa63   : > { %5079 = vmatprep.subr.bf16.mxu1 %v5266_v58 }
 0xa66   : > { %5081 = vmatpush3.bf16.msra.mxu1 %v5080_v39 }
 0xa67   : > { %5082 = vmatprep.subr.bf16.mxu1 %v5266_v58 }
 0xa6a   : > { %5084 = vmatpush3.bf16.msra.mxu1 %v5083_v42 }
 0xa6b   : > { %5085 = vmatprep.subr.bf16.mxu1 %v5266_v58 }
 0xa6e   : > { %5087 = vmatpush3.bf16.msra.mxu1 %v5086_v45 }
 0xa6f   : > { %5088 = vmatprep.subr.bf16.mxu1 %v5266_v58 }
 0xa72   : > { %5090 = vmatpush3.bf16.msra.mxu1 %v5089_v21 }
 0xa73   : > { %5091 = vmatprep.subr.bf16.mxu1 %v5266_v58  ;;  %v3965_v58 = vld [vmem:[%s6734_s16 + $0x40] sm:$0xff] }
 0xa74   : > { %v5107_v9 = vpack.c.bf16 %v3966_v6, %v3965_v58 }
 0xa76   : > { %5093 = vmatpush3.bf16.msra.mxu1 %v5092_v48  ;;  %5108 = vmatpush3.bf16.msra.mxu0 %v5107_v9 }
 0xa77   : > { %4682 = vmatprep.subr.mxu1 %v5264_v7  ;;  %4707 = vmatprep.subr.mxu0 %v5264_v7  ;;  %v3968_v7 = vld [vmem:[%s6764_s27] sm:$0x1]  ;;  %s5206_s27 = scalar_lea.vmem %s5205_s19, 32 }
 0xa78   : > { %p5208_p1 = scmp.lt.s32.totalorder %s5206_s27, %s5200_s22 }
 0xa7a   : > { %4683 = vmatpush3.msra.mxu1 %v3880_v49  ;;  %4708 = vmatpush3.msk.msra.mxu0 %vm1669_vm1, %v3967_v10  ;;  %vm4045_vm1 = vcmask 73728   ;;  %p5209_p2 = por %p5208_p1, %p5207_p0 }
 0xa7c   : > { %p5210_p3 = pnand %p5209_p2, %p5203_p13 }
 0xb2c   : > { %v3698_v62 = vpop.f32.mrb[58].mxu1 }
 0xb2d   : > { %v3702_v57 = vadd.f32 %v3698_v62, %v6551_v26  ;;  %v4625_v63 = vpop.f32.mrb[59].mxu1 }
 0xb30   : > { %v3858_v0 = vpop.f32.mrb[60].mxu1 }
 0xb31   : > { %v3862_v2 = vadd.f32 %v3858_v0, %v3702_v57  ;;  %v4653_v3 = vpop.f32.mrb[61].mxu1 }
 0xb33   : > { %v3864_v4 = vadd.f32 %v3863_v1, %v3862_v2 }
 0xb35   : > { %v3865_v5 = vmax.f32 %v3864_v4, 0.0 }
 0xb37   : > { %4685 = vmatmul.mubr.msk.f32.vlgmr.msra.gmra.mrb[62].mxu1 %vm3882_vm2, %v3865_v5 }
 0xc0a   : > { %v3952_v12 = vpop.f32.mrb[62].mxu1 }
 0xc0b   : > { %v3953_v14 = vadd.f32 %v3952_v12, %v3881_v11  ;;  %v4686_v15 = vpop.f32.mrb[63].mxu1 }
 0xc0d   : > { %v3956_v16 = vmax.f32 %v3953_v14, 0.0 }
 0xc0f   : > { %4710 = vmatmul.mubr.msk.f32.vlgmr.msra.gmra.mrb[42].mxu0 %vm1878_vm6, %v3956_v16 }
 0xce2   : > { %v4041_v17 = vpop.f32.mrb[42].mxu0 }
 0xce3   : > { %v4042_v18 = vadd.f32 %v4041_v17, %v3968_v7  ;;  %v4711_v19 = vpop.f32.mrb[43].mxu0 }
 0xce5   : > { %4046 = vst.msk [vmem:[%s567_s20] sm:$0x1] %vm4045_vm1, %v4042_v18 }
 0xce6   : > { %5213 = shalt.err (!%p5210_p3)
}
 0xce7   : > { %s5214_s17 = scalar_lea.hbm %s6676_s30, 16  ;;  %s5218_s18 = scalar_lea.hbm %s6765_s24, 32 }
 0xce8   : > { %p5215_p4 = scmp.ne.s32.totalorder %s6676_s30, %s5214_s17  ;;  %p5219_p9 = scmp.lt.u32.totalorder %s6676_s30, %s6765_s24 }
 0xce9   : > { %p5220_p10 = scmp.lt.u32.totalorder %s5218_s18, %s5214_s17  ;;  %p5222_p12 = scmp.lt.u32.totalorder %s5214_s17, %s6676_s30 }
 0xcea   : > { %p5216_p7 = pnand %p5215_p4, %p5402_p5 }
 0xceb   : > { %p5221_p11 = por %p5220_p10, %p5219_p9 }
 0xcec   : > { %p5217_p8 = pneg %p5216_p7 }
 0xced   : > { %p5223_p13 = por %p5222_p12, %p5221_p11 }
 0xcef   : > { %p5224_p0 = pnand %p5223_p13, %p5217_p8 }
 0xcf1   : > { %5227 = shalt.err (!%p5224_p0)
}
 0xcf2   : > { %5157 = dma.vmem_to_hbm [thread:$0]  (%p5402_p5), %s6678_s21, 16, %s6676_s30, %s4048_s25  }
 0xcf3 PF: > { %s6766_s22 = sld [smem:[#allocation7_spill]]  ;;  %s6767_s19 = sld [smem:[#allocation5_spill]] }
 0xcf9   : > { %p5163_p1 = scmp.ge.s32.totalorder %s6766_s22, 2  ;;  %s4072_s23 = sand.u32 1, %s6767_s19  }
 0xcfa   : > { %s4073_s20 = scalar_lea.sflag [#allocation3], %s4072_s23 }
 0xcfb   : > { %p5160_p2 = pnand %p5163_p1, %p5406_p6 }
 0xcfd   : > { %5245 = dma.done.wait (!%p5160_p2), %s4073_s20, 16  }
 0xcfe   : > { %5247 = vsyncadd (!%p5160_p2), %s4073_s20, 4294967280  ;;  %s6769_s30 = sld [smem:[#allocation8_spill]]  ;;  %s6770_s17 = sld [smem:[#allocation6_spill]] }
 0xcff   : > { %s6771_s29 = sld [smem:[#allocation9_spill]]  ;;  %s6772_s27 = smov %s5254_s28 }
 0xd04   : > { %p28_p3 = scmp.ge.s32.totalorder %s6769_s30, 4   ;;  %s6773_s28 = smov %s6770_s17 }
 0xd06   :  { %30 = sbr.rel (!%p28_p3) target bundleno = 9 (0x9), region = 151 }
 0xd0d   :  { %4077 = vsyncpa [#allocation3], 1 }
 0xd0e   :  { %4079 = vsyncpa [#allocation3 + $0x1], 1 }

</bundles_post_ra>
